<compile_context>
chip_gen: v5e
topology: v5e:2x2
jax: 0.10.0
libtpu: 0.0.40
codegen_flags: <defaults>
</compile_context>

<pallas_src>
import math
from functools import partial

import jax
import jax.numpy as jnp
from jax.experimental import pallas as pl
from jax.experimental.pallas import tpu as pltpu

# ---- model hyperparameters (small, consistent with the module defaults) ----
VOCAB = 20          # vocab_size
NUM_HIDDENS = 32    # num_hiddens == key/query/value size
NUM_HEADS = 4
FFN_HIDDENS = 64    # ffn_num_hiddens
NUM_LAYERS = 2
SEQ = 8
BATCH = 2
LN_EPS = 1e-5       # PyTorch nn.LayerNorm default


def _layer_norm(x, gamma, beta):
    mean = jnp.mean(x, axis=-1, keepdims=True)
    var = jnp.mean((x - mean) ** 2, axis=-1, keepdims=True)
    return (x - mean) * jax.lax.rsqrt(var + LN_EPS) * gamma + beta


# -------------------- fused kernel: embeddings + all encoder blocks --------------------
def chet_fused_kernel(vlen_ref, ids_ref,                 # scalar-prefetch (SMEM)
                      prop_ref, table_ref, wpb_ref,      # VMEM inputs
                      w_ref, b_ref,                      # packed per-layer weights
                      o_ref, *, num_heads, num_layers):
    b = pl.program_id(0)
    S = prop_ref.shape[1]
    H = table_ref.shape[2]
    F = (w_ref.shape[2] - 4 * H) // 2        # ffn hidden width
    d = H // num_heads
    scale = 1.0 / math.sqrt(d)

    # ---- embeddings: gather rows by dynamic leading-dim index (no one-hot) ----
    rows = [table_ref[ids_ref[b, s]] for s in range(S)]      # each (1, H)
    emb = jnp.concatenate(rows, axis=0)                      # (S, H)
    prop = prop_ref[0]                                       # (S, 1)
    # proportion_embedding = Linear(1, H): p * w + b
    x = emb + prop * wpb_ref[0:1, :] + wpb_ref[1:2, :]       # (S, H)

    # ---- attention mask (d2l masked_softmax semantics), hoisted out of layer loop ----
    vlen = vlen_ref[b]
    key_idx = jax.lax.broadcasted_iota(jnp.int32, (S, S), 1)
    mask = key_idx < vlen

    # ---- unrolled encoder blocks ----
    for L in range(num_layers):
        W = w_ref[L]       # (H, 4H + 2F) packed: [wq|wk|wv|wo|w1|w2_top|w2_bot]
        Bz = b_ref[L]      # (8, 4H) packed bias / LN slab

        wqkv = W[:, 0:3 * H]
        wo   = W[:, 3 * H:4 * H]
        w1   = W[:, 4 * H:4 * H + F]
        bqkv = Bz[0:1, 0:3 * H]
        bo   = Bz[0:1, 3 * H:4 * H]
        b1   = Bz[1:2, 0:F]
        b2   = Bz[1:2, F:F + H]
        g1   = Bz[2:3, 0:H]
        be1  = Bz[2:3, H:2 * H]
        g2   = Bz[2:3, 2 * H:3 * H]
        be2  = Bz[2:3, 3 * H:4 * H]

        # fused Q|K|V projection: one MXU op
        qkv = jnp.dot(x, wqkv, preferred_element_type=jnp.float32) + bqkv  # (S, 3H)

        heads = []
        for h_i in range(num_heads):
            lo = h_i * d
            qh = qkv[:, lo:lo + d]
            kh = qkv[:, H + lo:H + lo + d]
            vh = qkv[:, 2 * H + lo:2 * H + lo + d]
            scores = jnp.dot(qh, kh.T, preferred_element_type=jnp.float32) * scale
            scores = jnp.where(mask, scores, -1e6)
            m = jnp.max(scores, axis=-1, keepdims=True)
            e = jnp.exp(scores - m)
            p = e * pl.reciprocal(jnp.sum(e, axis=-1, keepdims=True), approx=True)
            heads.append(jnp.dot(p, vh, preferred_element_type=jnp.float32))

        # concat heads then one matmul with Wo
        attn = jnp.concatenate(heads, axis=-1)                              # (S, H)
        attn = jnp.dot(attn, wo, preferred_element_type=jnp.float32) + bo

        # AddNorm 1 (dropout is identity at inference)
        y = _layer_norm(x + attn, g1, be1)

        # Position-wise FFN; w2 (F,H) stored as F//H lane-packed (H,H) chunks
        h1 = jnp.maximum(jnp.dot(y, w1, preferred_element_type=jnp.float32) + b1, 0.0)
        chunks = [
            jnp.dot(h1[:, c * H:(c + 1) * H],
                    W[:, 4 * H + F + c * H:4 * H + F + (c + 1) * H],
                    preferred_element_type=jnp.float32)
            for c in range(F // H)
        ]
        ffn = sum(chunks) + b2

        # AddNorm 2
        x = _layer_norm(y + ffn, g2, be2)

    o_ref[0] = x


# -------------------- weight packing --------------------
def _pack_layer(L, H, F):
    w2 = L["w2"]
    w2_chunks = [w2[c * H:(c + 1) * H, :] for c in range(F // H)]
    W = jnp.concatenate([L["wq"], L["wk"], L["wv"], L["wo"], L["w1"], *w2_chunks],
                        axis=1)                                            # (H, 4H+2F)
    row0 = jnp.concatenate([L["bq"], L["bk"], L["bv"], L["bo"]], axis=1)   # (1, 4H)
    row1 = jnp.concatenate(
        [L["b1"], L["b2"], jnp.zeros((1, 4 * H - F - H), jnp.float32)], axis=1)
    row2 = jnp.concatenate([L["g1"], L["be1"], L["g2"], L["be2"]], axis=1)
    Bz = jnp.concatenate([row0, row1, row2, jnp.zeros((5, 4 * H), jnp.float32)],
                         axis=0)                                           # (8, 4H)
    return W, Bz


# -------------------- wrapper --------------------
def chet_encoder_forward(params, element_numbers, proportions, valid_lens):
    B, S = element_numbers.shape
    H, F, V = NUM_HIDDENS, FFN_HIDDENS, VOCAB
    assert F % H == 0 and F + H <= 4 * H

    ids = element_numbers.astype(jnp.int32)                # (B, S) -> SMEM prefetch
    vlens = valid_lens.astype(jnp.int32)                   # (B,)   -> SMEM prefetch
    prop3 = proportions.astype(jnp.float32).reshape(B, S, 1)
    table3 = params["emb_table"].reshape(V, 1, H)          # leading dim = gather index
    wpb = jnp.concatenate([params["wp"], params["bp"]], axis=0)   # (2, H)

    packed = [_pack_layer(L, H, F) for L in params["layers"]]
    W_all = jnp.stack([p[0] for p in packed])              # (L, H, 4H+2F)
    B_all = jnp.stack([p[1] for p in packed])              # (L, 8, 4H)

    kernel = partial(chet_fused_kernel, num_heads=NUM_HEADS, num_layers=NUM_LAYERS)
    return pl.pallas_call(
        kernel,
        out_shape=jax.ShapeDtypeStruct((B, S, H), jnp.float32),
        grid_spec=pltpu.PrefetchScalarGridSpec(
            num_scalar_prefetch=2,
            grid=(B,),
            in_specs=[
                pl.BlockSpec((1, S, 1), lambda b, vl, eid: (b, 0, 0)),   # proportions
                pl.BlockSpec((V, 1, H), lambda b, vl, eid: (0, 0, 0)),   # emb table
                pl.BlockSpec((2, H), lambda b, vl, eid: (0, 0)),         # wp|bp
                pl.BlockSpec(W_all.shape, lambda b, vl, eid: (0, 0, 0)),  # weight slabs
                pl.BlockSpec(B_all.shape, lambda b, vl, eid: (0, 0, 0)),  # bias slabs
            ],
            out_specs=pl.BlockSpec((1, S, H), lambda b, vl, eid: (b, 0, 0)),
        ),
        compiler_params=pltpu.CompilerParams(dimension_semantics=("parallel",)),
    )(vlens, ids, prop3, table3, wpb, W_all, B_all)


# -------------------- deterministic parameter init --------------------
def init_params(key):
    keys = jax.random.split(key, 4 + NUM_LAYERS)

    def norm(k, shape, scale=0.1):
        return (scale * jax.random.normal(k, shape)).astype(jnp.float32)

    params = {
        "emb_table": norm(keys[0], (VOCAB, NUM_HIDDENS)),
        "wp": norm(keys[1], (1, NUM_HIDDENS)),
        "bp": norm(keys[2], (1, NUM_HIDDENS)),
        "layers": [],
    }
    for i in range(NUM_LAYERS):
        lk = jax.random.split(keys[4 + i], 12)
        params["layers"].append(dict(
            wq=norm(lk[0], (NUM_HIDDENS, NUM_HIDDENS)),
            bq=norm(lk[1], (1, NUM_HIDDENS)),
            wk=norm(lk[2], (NUM_HIDDENS, NUM_HIDDENS)),
            bk=norm(lk[3], (1, NUM_HIDDENS)),
            wv=norm(lk[4], (NUM_HIDDENS, NUM_HIDDENS)),
            bv=norm(lk[5], (1, NUM_HIDDENS)),
            wo=norm(lk[6], (NUM_HIDDENS, NUM_HIDDENS)),
            bo=norm(lk[7], (1, NUM_HIDDENS)),
            g1=jnp.ones((1, NUM_HIDDENS), jnp.float32),
            be1=jnp.zeros((1, NUM_HIDDENS), jnp.float32),
            w1=norm(lk[8], (NUM_HIDDENS, FFN_HIDDENS)),
            b1=norm(lk[9], (1, FFN_HIDDENS)),
            w2=norm(lk[10], (FFN_HIDDENS, NUM_HIDDENS)),
            b2=norm(lk[11], (1, NUM_HIDDENS)),
            g2=jnp.ones((1, NUM_HIDDENS), jnp.float32),
            be2=jnp.zeros((1, NUM_HIDDENS), jnp.float32),
        ))
    return params


# -------------------- pure-JAX reference (for correctness check) --------------------
def reference_forward(params, ids, props, vlens):
    emb = params["emb_table"][ids]                                   # (B,S,H)
    x = props[..., None] * params["wp"][0] + params["bp"][0] + emb   # (B,S,H)
    B, S, H = x.shape
    d = H // NUM_HEADS
    key_idx = jnp.arange(S)
    for L in params["layers"]:
        q = x @ L["wq"] + L["bq"]
        k = x @ L["wk"] + L["bk"]
        v = x @ L["wv"] + L["bv"]

        def split(t):
            return t.reshape(B, S, NUM_HEADS, d).transpose(0, 2, 1, 3)

        qh, kh, vh = split(q), split(k), split(v)
        scores = jnp.einsum("bhqd,bhkd->bhqk", qh, kh) / math.sqrt(d)
        mask = key_idx[None, None, None, :] < vlens[:, None, None, None]
        scores = jnp.where(mask, scores, -1e6)
        p = jax.nn.softmax(scores, axis=-1)
        o = jnp.einsum("bhqk,bhkd->bhqd", p, vh).transpose(0, 2, 1, 3).reshape(B, S, H)
        attn = o @ L["wo"] + L["bo"]
        y = _layer_norm(x + attn, L["g1"], L["be1"])
        ffn = jnp.maximum(y @ L["w1"] + L["b1"], 0.0) @ L["w2"] + L["b2"]
        x = _layer_norm(y + ffn, L["g2"], L["be2"])
    return x


if __name__ == "__main__":
    key = jax.random.PRNGKey(0)
    pkey, ikey, prkey = jax.random.split(key, 3)
    params = init_params(pkey)

    element_numbers = jax.random.randint(ikey, (BATCH, SEQ), 0, VOCAB)
    proportions = jax.random.uniform(prkey, (BATCH, SEQ), dtype=jnp.float32)
    valid_lens = jnp.array([5, 8], dtype=jnp.int32)

    out = chet_encoder_forward(params, element_numbers, proportions, valid_lens)
    out = jax.block_until_ready(out)
    assert out.shape == (BATCH, SEQ, NUM_HIDDENS)

    ref = reference_forward(params, element_numbers, proportions, valid_lens)
    max_err = float(jnp.max(jnp.abs(out - ref)))
    assert jnp.allclose(out, ref, atol=1e-2, rtol=1e-2), max_err

    print("KERNEL_OK")
</pallas_src>

<mosaic_0001>
module attributes {stable_mosaic.version = 11 : i64} {
  func.func @chet_fused_kernel(%arg0: i32, %arg1: memref<2xi32, #tpu.memory_space<smem>>, %arg2: memref<2x8xi32, #tpu.memory_space<smem>>, %arg3: memref<1x8x1xf32, #tpu.memory_space<vmem>>, %arg4: memref<20x1x32xf32, #tpu.memory_space<vmem>>, %arg5: memref<2x32xf32, #tpu.memory_space<vmem>>, %arg6: memref<2x32x256xf32, #tpu.memory_space<vmem>>, %arg7: memref<2x8x128xf32, #tpu.memory_space<vmem>>, %arg8: memref<1x8x32xf32, #tpu.memory_space<vmem>>) attributes {dimension_semantics = [#tpu.dimension_semantics<parallel>], iteration_bounds = array<i64: 2>, scalar_prefetch = 2 : i64, scratch_operands = 0 : i64, tpu.core_type = #tpu.core_type<tc>, window_params = [{transform_indices = @transform_0, window_bounds = array<i64: 1, 8, 1>}, {pipeline_mode = #tpu.pipeline_mode<synchronous>, transform_indices = @transform_1, window_bounds = array<i64: 20, 1, 32>}, {pipeline_mode = #tpu.pipeline_mode<synchronous>, transform_indices = @transform_2, window_bounds = array<i64: 2, 32>}, {pipeline_mode = #tpu.pipeline_mode<synchronous>, transform_indices = @transform_3, window_bounds = array<i64: 2, 32, 256>}, {pipeline_mode = #tpu.pipeline_mode<synchronous>, transform_indices = @transform_4, window_bounds = array<i64: 2, 8, 128>}, {transform_indices = @transform_5, window_bounds = array<i64: 1, 8, 32>}]} {
    %0 = arith.index_cast %arg0 : i32 to index
    %c0 = arith.constant 0 : index
    %1 = memref.load %arg2[%0, %c0] : memref<2x8xi32, #tpu.memory_space<smem>>
    %2 = arith.index_cast %1 : i32 to index
    %c0_0 = arith.constant 0 : index
    %c0_1 = arith.constant 0 : index
    %3 = vector.load %arg4[%2, %c0_0, %c0_1] : memref<20x1x32xf32, #tpu.memory_space<vmem>>, vector<1x1x32xf32>
    %4 = vector.shape_cast %3 : vector<1x1x32xf32> to vector<1x32xf32>
    %5 = arith.index_cast %arg0 : i32 to index
    %c1 = arith.constant 1 : index
    %6 = memref.load %arg2[%5, %c1] : memref<2x8xi32, #tpu.memory_space<smem>>
    %7 = arith.index_cast %6 : i32 to index
    %c0_2 = arith.constant 0 : index
    %c0_3 = arith.constant 0 : index
    %8 = vector.load %arg4[%7, %c0_2, %c0_3] : memref<20x1x32xf32, #tpu.memory_space<vmem>>, vector<1x1x32xf32>
    %9 = vector.shape_cast %8 : vector<1x1x32xf32> to vector<1x32xf32>
    %10 = arith.index_cast %arg0 : i32 to index
    %c2 = arith.constant 2 : index
    %11 = memref.load %arg2[%10, %c2] : memref<2x8xi32, #tpu.memory_space<smem>>
    %12 = arith.index_cast %11 : i32 to index
    %c0_4 = arith.constant 0 : index
    %c0_5 = arith.constant 0 : index
    %13 = vector.load %arg4[%12, %c0_4, %c0_5] : memref<20x1x32xf32, #tpu.memory_space<vmem>>, vector<1x1x32xf32>
    %14 = vector.shape_cast %13 : vector<1x1x32xf32> to vector<1x32xf32>
    %15 = arith.index_cast %arg0 : i32 to index
    %c3 = arith.constant 3 : index
    %16 = memref.load %arg2[%15, %c3] : memref<2x8xi32, #tpu.memory_space<smem>>
    %17 = arith.index_cast %16 : i32 to index
    %c0_6 = arith.constant 0 : index
    %c0_7 = arith.constant 0 : index
    %18 = vector.load %arg4[%17, %c0_6, %c0_7] : memref<20x1x32xf32, #tpu.memory_space<vmem>>, vector<1x1x32xf32>
    %19 = vector.shape_cast %18 : vector<1x1x32xf32> to vector<1x32xf32>
    %20 = arith.index_cast %arg0 : i32 to index
    %c4 = arith.constant 4 : index
    %21 = memref.load %arg2[%20, %c4] : memref<2x8xi32, #tpu.memory_space<smem>>
    %22 = arith.index_cast %21 : i32 to index
    %c0_8 = arith.constant 0 : index
    %c0_9 = arith.constant 0 : index
    %23 = vector.load %arg4[%22, %c0_8, %c0_9] : memref<20x1x32xf32, #tpu.memory_space<vmem>>, vector<1x1x32xf32>
    %24 = vector.shape_cast %23 : vector<1x1x32xf32> to vector<1x32xf32>
    %25 = arith.index_cast %arg0 : i32 to index
    %c5 = arith.constant 5 : index
    %26 = memref.load %arg2[%25, %c5] : memref<2x8xi32, #tpu.memory_space<smem>>
    %27 = arith.index_cast %26 : i32 to index
    %c0_10 = arith.constant 0 : index
    %c0_11 = arith.constant 0 : index
    %28 = vector.load %arg4[%27, %c0_10, %c0_11] : memref<20x1x32xf32, #tpu.memory_space<vmem>>, vector<1x1x32xf32>
    %29 = vector.shape_cast %28 : vector<1x1x32xf32> to vector<1x32xf32>
    %30 = arith.index_cast %arg0 : i32 to index
    %c6 = arith.constant 6 : index
    %31 = memref.load %arg2[%30, %c6] : memref<2x8xi32, #tpu.memory_space<smem>>
    %32 = arith.index_cast %31 : i32 to index
    %c0_12 = arith.constant 0 : index
    %c0_13 = arith.constant 0 : index
    %33 = vector.load %arg4[%32, %c0_12, %c0_13] : memref<20x1x32xf32, #tpu.memory_space<vmem>>, vector<1x1x32xf32>
    %34 = vector.shape_cast %33 : vector<1x1x32xf32> to vector<1x32xf32>
    %35 = arith.index_cast %arg0 : i32 to index
    %c7 = arith.constant 7 : index
    %36 = memref.load %arg2[%35, %c7] : memref<2x8xi32, #tpu.memory_space<smem>>
    %37 = arith.index_cast %36 : i32 to index
    %c0_14 = arith.constant 0 : index
    %c0_15 = arith.constant 0 : index
    %38 = vector.load %arg4[%37, %c0_14, %c0_15] : memref<20x1x32xf32, #tpu.memory_space<vmem>>, vector<1x1x32xf32>
    %39 = vector.shape_cast %38 : vector<1x1x32xf32> to vector<1x32xf32>
    %40 = tpu.concatenate %4, %9, %14, %19, %24, %29, %34, %39 in 0 : vector<1x32xf32>, vector<1x32xf32>, vector<1x32xf32>, vector<1x32xf32>, vector<1x32xf32>, vector<1x32xf32>, vector<1x32xf32>, vector<1x32xf32> -> vector<8x32xf32>
    %c0_16 = arith.constant 0 : index
    %c0_17 = arith.constant 0 : index
    %c0_18 = arith.constant 0 : index
    %41 = vector.load %arg3[%c0_16, %c0_17, %c0_18] : memref<1x8x1xf32, #tpu.memory_space<vmem>>, vector<1x8x1xf32>
    %42 = vector.shape_cast %41 : vector<1x8x1xf32> to vector<8x1xf32>
    %c0_19 = arith.constant 0 : index
    %c0_20 = arith.constant 0 : index
    %43 = vector.load %arg5[%c0_19, %c0_20] : memref<2x32xf32, #tpu.memory_space<vmem>>, vector<1x32xf32>
    %44 = vector.broadcast %42 : vector<8x1xf32> to vector<8x32xf32>
    %45 = vector.broadcast %43 : vector<1x32xf32> to vector<8x32xf32>
    %46 = arith.mulf %44, %45 : vector<8x32xf32>
    %47 = arith.addf %40, %46 : vector<8x32xf32>
    %c1_21 = arith.constant 1 : index
    %c0_22 = arith.constant 0 : index
    %48 = vector.load %arg5[%c1_21, %c0_22] : memref<2x32xf32, #tpu.memory_space<vmem>>, vector<1x32xf32>
    %49 = vector.broadcast %48 : vector<1x32xf32> to vector<8x32xf32>
    %50 = arith.addf %47, %49 : vector<8x32xf32>
    %51 = arith.index_cast %arg0 : i32 to index
    %52 = memref.load %arg1[%51] : memref<2xi32, #tpu.memory_space<smem>>
    %53 = tpu.iota {dimensions = array<i32: 1>} : vector<8x8xi32>
    %54 = vector.broadcast %52 : i32 to vector<8x8xi32>
    %55 = arith.cmpi slt, %53, %54 : vector<8x8xi32>
    %c0_23 = arith.constant 0 : index
    %c0_24 = arith.constant 0 : index
    %c0_25 = arith.constant 0 : index
    %56 = vector.load %arg6[%c0_23, %c0_24, %c0_25] : memref<2x32x256xf32, #tpu.memory_space<vmem>>, vector<1x32x256xf32>
    %57 = vector.shape_cast %56 : vector<1x32x256xf32> to vector<32x256xf32>
    %c0_26 = arith.constant 0 : index
    %c0_27 = arith.constant 0 : index
    %c0_28 = arith.constant 0 : index
    %58 = vector.load %arg7[%c0_26, %c0_27, %c0_28] : memref<2x8x128xf32, #tpu.memory_space<vmem>>, vector<1x8x128xf32>
    %59 = vector.shape_cast %58 : vector<1x8x128xf32> to vector<8x128xf32>
    %60 = vector.extract_strided_slice %57 {offsets = [0, 0], sizes = [32, 96], strides = [1, 1]} : vector<32x256xf32> to vector<32x96xf32>
    %61 = vector.extract_strided_slice %57 {offsets = [0, 96], sizes = [32, 32], strides = [1, 1]} : vector<32x256xf32> to vector<32x32xf32>
    %62 = vector.extract_strided_slice %57 {offsets = [0, 128], sizes = [32, 64], strides = [1, 1]} : vector<32x256xf32> to vector<32x64xf32>
    %63 = vector.extract_strided_slice %59 {offsets = [0, 0], sizes = [1, 96], strides = [1, 1]} : vector<8x128xf32> to vector<1x96xf32>
    %64 = vector.extract_strided_slice %59 {offsets = [0, 96], sizes = [1, 32], strides = [1, 1]} : vector<8x128xf32> to vector<1x32xf32>
    %65 = vector.extract_strided_slice %59 {offsets = [1, 0], sizes = [1, 64], strides = [1, 1]} : vector<8x128xf32> to vector<1x64xf32>
    %66 = vector.extract_strided_slice %59 {offsets = [1, 64], sizes = [1, 32], strides = [1, 1]} : vector<8x128xf32> to vector<1x32xf32>
    %67 = vector.extract_strided_slice %59 {offsets = [2, 0], sizes = [1, 32], strides = [1, 1]} : vector<8x128xf32> to vector<1x32xf32>
    %68 = vector.extract_strided_slice %59 {offsets = [2, 32], sizes = [1, 32], strides = [1, 1]} : vector<8x128xf32> to vector<1x32xf32>
    %69 = vector.extract_strided_slice %59 {offsets = [2, 64], sizes = [1, 32], strides = [1, 1]} : vector<8x128xf32> to vector<1x32xf32>
    %70 = vector.extract_strided_slice %59 {offsets = [2, 96], sizes = [1, 32], strides = [1, 1]} : vector<8x128xf32> to vector<1x32xf32>
    %cst = arith.constant dense<0.000000e+00> : vector<8x96xf32>
    %71 = tpu.matmul %50, %60, %cst {dimension_numbers = #tpu.dot_dimension_numbers<[1], [0], [0], [1], [0, 0, 1, 1], [], []>} : vector<8x32xf32>, vector<32x96xf32>, vector<8x96xf32> -> vector<8x96xf32>
    %72 = vector.broadcast %63 : vector<1x96xf32> to vector<8x96xf32>
    %73 = arith.addf %71, %72 : vector<8x96xf32>
    %74 = vector.extract_strided_slice %73 {offsets = [0, 0], sizes = [8, 8], strides = [1, 1]} : vector<8x96xf32> to vector<8x8xf32>
    %75 = vector.extract_strided_slice %73 {offsets = [0, 32], sizes = [8, 8], strides = [1, 1]} : vector<8x96xf32> to vector<8x8xf32>
    %76 = vector.extract_strided_slice %73 {offsets = [0, 64], sizes = [8, 8], strides = [1, 1]} : vector<8x96xf32> to vector<8x8xf32>
    %77 = tpu.transpose %75, [1, 0] : vector<8x8xf32> -> vector<8x8xf32>
    %cst_29 = arith.constant dense<0.000000e+00> : vector<8x8xf32>
    %78 = tpu.matmul %74, %77, %cst_29 {dimension_numbers = #tpu.dot_dimension_numbers<[1], [0], [0], [1], [0, 0, 1, 1], [], []>} : vector<8x8xf32>, vector<8x8xf32>, vector<8x8xf32> -> vector<8x8xf32>
    %cst_30 = arith.constant 0.353553385 : f32
    %79 = vector.broadcast %cst_30 : f32 to vector<8x8xf32>
    %80 = arith.mulf %78, %79 : vector<8x8xf32>
    %cst_31 = arith.constant -1.000000e+06 : f32
    %81 = vector.broadcast %cst_31 : f32 to vector<8x8xf32>
    %82 = arith.select %55, %80, %81 : vector<8x8xi1>, vector<8x8xf32>
    %cst_32 = arith.constant dense<0xFF800000> : vector<8xf32>
    %83 = vector.multi_reduction <maximumf>, %82, %cst_32 [1] : vector<8x8xf32> to vector<8xf32>
    %84 = vector.shape_cast %83 : vector<8xf32> to vector<8x1xf32>
    %85 = vector.broadcast %84 : vector<8x1xf32> to vector<8x8xf32>
    %86 = arith.subf %82, %85 : vector<8x8xf32>
    %87 = math.exp %86 : vector<8x8xf32>
    %cst_33 = arith.constant dense<0.000000e+00> : vector<8xf32>
    %88 = vector.multi_reduction <add>, %87, %cst_33 [1] : vector<8x8xf32> to vector<8xf32>
    %89 = vector.shape_cast %88 : vector<8xf32> to vector<8x1xf32>
    %90 = tpu.reciprocal %89 {approx = true} : vector<8x1xf32> -> vector<8x1xf32>
    %91 = vector.broadcast %90 : vector<8x1xf32> to vector<8x8xf32>
    %92 = arith.mulf %87, %91 : vector<8x8xf32>
    %cst_34 = arith.constant dense<0.000000e+00> : vector<8x8xf32>
    %93 = tpu.matmul %92, %76, %cst_34 {dimension_numbers = #tpu.dot_dimension_numbers<[1], [0], [0], [1], [0, 0, 1, 1], [], []>} : vector<8x8xf32>, vector<8x8xf32>, vector<8x8xf32> -> vector<8x8xf32>
    %94 = vector.extract_strided_slice %73 {offsets = [0, 8], sizes = [8, 8], strides = [1, 1]} : vector<8x96xf32> to vector<8x8xf32>
    %95 = vector.extract_strided_slice %73 {offsets = [0, 40], sizes = [8, 8], strides = [1, 1]} : vector<8x96xf32> to vector<8x8xf32>
    %96 = vector.extract_strided_slice %73 {offsets = [0, 72], sizes = [8, 8], strides = [1, 1]} : vector<8x96xf32> to vector<8x8xf32>
    %97 = tpu.transpose %95, [1, 0] : vector<8x8xf32> -> vector<8x8xf32>
    %cst_35 = arith.constant dense<0.000000e+00> : vector<8x8xf32>
    %98 = tpu.matmul %94, %97, %cst_35 {dimension_numbers = #tpu.dot_dimension_numbers<[1], [0], [0], [1], [0, 0, 1, 1], [], []>} : vector<8x8xf32>, vector<8x8xf32>, vector<8x8xf32> -> vector<8x8xf32>
    %cst_36 = arith.constant 0.353553385 : f32
    %99 = vector.broadcast %cst_36 : f32 to vector<8x8xf32>
    %100 = arith.mulf %98, %99 : vector<8x8xf32>
    %cst_37 = arith.constant -1.000000e+06 : f32
    %101 = vector.broadcast %cst_37 : f32 to vector<8x8xf32>
    %102 = arith.select %55, %100, %101 : vector<8x8xi1>, vector<8x8xf32>
    %cst_38 = arith.constant dense<0xFF800000> : vector<8xf32>
    %103 = vector.multi_reduction <maximumf>, %102, %cst_38 [1] : vector<8x8xf32> to vector<8xf32>
    %104 = vector.shape_cast %103 : vector<8xf32> to vector<8x1xf32>
    %105 = vector.broadcast %104 : vector<8x1xf32> to vector<8x8xf32>
    %106 = arith.subf %102, %105 : vector<8x8xf32>
    %107 = math.exp %106 : vector<8x8xf32>
    %cst_39 = arith.constant dense<0.000000e+00> : vector<8xf32>
    %108 = vector.multi_reduction <add>, %107, %cst_39 [1] : vector<8x8xf32> to vector<8xf32>
    %109 = vector.shape_cast %108 : vector<8xf32> to vector<8x1xf32>
    %110 = tpu.reciprocal %109 {approx = true} : vector<8x1xf32> -> vector<8x1xf32>
    %111 = vector.broadcast %110 : vector<8x1xf32> to vector<8x8xf32>
    %112 = arith.mulf %107, %111 : vector<8x8xf32>
    %cst_40 = arith.constant dense<0.000000e+00> : vector<8x8xf32>
    %113 = tpu.matmul %112, %96, %cst_40 {dimension_numbers = #tpu.dot_dimension_numbers<[1], [0], [0], [1], [0, 0, 1, 1], [], []>} : vector<8x8xf32>, vector<8x8xf32>, vector<8x8xf32> -> vector<8x8xf32>
    %114 = vector.extract_strided_slice %73 {offsets = [0, 16], sizes = [8, 8], strides = [1, 1]} : vector<8x96xf32> to vector<8x8xf32>
    %115 = vector.extract_strided_slice %73 {offsets = [0, 48], sizes = [8, 8], strides = [1, 1]} : vector<8x96xf32> to vector<8x8xf32>
    %116 = vector.extract_strided_slice %73 {offsets = [0, 80], sizes = [8, 8], strides = [1, 1]} : vector<8x96xf32> to vector<8x8xf32>
    %117 = tpu.transpose %115, [1, 0] : vector<8x8xf32> -> vector<8x8xf32>
    %cst_41 = arith.constant dense<0.000000e+00> : vector<8x8xf32>
    %118 = tpu.matmul %114, %117, %cst_41 {dimension_numbers = #tpu.dot_dimension_numbers<[1], [0], [0], [1], [0, 0, 1, 1], [], []>} : vector<8x8xf32>, vector<8x8xf32>, vector<8x8xf32> -> vector<8x8xf32>
    %cst_42 = arith.constant 0.353553385 : f32
    %119 = vector.broadcast %cst_42 : f32 to vector<8x8xf32>
    %120 = arith.mulf %118, %119 : vector<8x8xf32>
    %cst_43 = arith.constant -1.000000e+06 : f32
    %121 = vector.broadcast %cst_43 : f32 to vector<8x8xf32>
    %122 = arith.select %55, %120, %121 : vector<8x8xi1>, vector<8x8xf32>
    %cst_44 = arith.constant dense<0xFF800000> : vector<8xf32>
    %123 = vector.multi_reduction <maximumf>, %122, %cst_44 [1] : vector<8x8xf32> to vector<8xf32>
    %124 = vector.shape_cast %123 : vector<8xf32> to vector<8x1xf32>
    %125 = vector.broadcast %124 : vector<8x1xf32> to vector<8x8xf32>
    %126 = arith.subf %122, %125 : vector<8x8xf32>
    %127 = math.exp %126 : vector<8x8xf32>
    %cst_45 = arith.constant dense<0.000000e+00> : vector<8xf32>
    %128 = vector.multi_reduction <add>, %127, %cst_45 [1] : vector<8x8xf32> to vector<8xf32>
    %129 = vector.shape_cast %128 : vector<8xf32> to vector<8x1xf32>
    %130 = tpu.reciprocal %129 {approx = true} : vector<8x1xf32> -> vector<8x1xf32>
    %131 = vector.broadcast %130 : vector<8x1xf32> to vector<8x8xf32>
    %132 = arith.mulf %127, %131 : vector<8x8xf32>
    %cst_46 = arith.constant dense<0.000000e+00> : vector<8x8xf32>
    %133 = tpu.matmul %132, %116, %cst_46 {dimension_numbers = #tpu.dot_dimension_numbers<[1], [0], [0], [1], [0, 0, 1, 1], [], []>} : vector<8x8xf32>, vector<8x8xf32>, vector<8x8xf32> -> vector<8x8xf32>
    %134 = vector.extract_strided_slice %73 {offsets = [0, 24], sizes = [8, 8], strides = [1, 1]} : vector<8x96xf32> to vector<8x8xf32>
    %135 = vector.extract_strided_slice %73 {offsets = [0, 56], sizes = [8, 8], strides = [1, 1]} : vector<8x96xf32> to vector<8x8xf32>
    %136 = vector.extract_strided_slice %73 {offsets = [0, 88], sizes = [8, 8], strides = [1, 1]} : vector<8x96xf32> to vector<8x8xf32>
    %137 = tpu.transpose %135, [1, 0] : vector<8x8xf32> -> vector<8x8xf32>
    %cst_47 = arith.constant dense<0.000000e+00> : vector<8x8xf32>
    %138 = tpu.matmul %134, %137, %cst_47 {dimension_numbers = #tpu.dot_dimension_numbers<[1], [0], [0], [1], [0, 0, 1, 1], [], []>} : vector<8x8xf32>, vector<8x8xf32>, vector<8x8xf32> -> vector<8x8xf32>
    %cst_48 = arith.constant 0.353553385 : f32
    %139 = vector.broadcast %cst_48 : f32 to vector<8x8xf32>
    %140 = arith.mulf %138, %139 : vector<8x8xf32>
    %cst_49 = arith.constant -1.000000e+06 : f32
    %141 = vector.broadcast %cst_49 : f32 to vector<8x8xf32>
    %142 = arith.select %55, %140, %141 : vector<8x8xi1>, vector<8x8xf32>
    %cst_50 = arith.constant dense<0xFF800000> : vector<8xf32>
    %143 = vector.multi_reduction <maximumf>, %142, %cst_50 [1] : vector<8x8xf32> to vector<8xf32>
    %144 = vector.shape_cast %143 : vector<8xf32> to vector<8x1xf32>
    %145 = vector.broadcast %144 : vector<8x1xf32> to vector<8x8xf32>
    %146 = arith.subf %142, %145 : vector<8x8xf32>
    %147 = math.exp %146 : vector<8x8xf32>
    %cst_51 = arith.constant dense<0.000000e+00> : vector<8xf32>
    %148 = vector.multi_reduction <add>, %147, %cst_51 [1] : vector<8x8xf32> to vector<8xf32>
    %149 = vector.shape_cast %148 : vector<8xf32> to vector<8x1xf32>
    %150 = tpu.reciprocal %149 {approx = true} : vector<8x1xf32> -> vector<8x1xf32>
    %151 = vector.broadcast %150 : vector<8x1xf32> to vector<8x8xf32>
    %152 = arith.mulf %147, %151 : vector<8x8xf32>
    %cst_52 = arith.constant dense<0.000000e+00> : vector<8x8xf32>
    %153 = tpu.matmul %152, %136, %cst_52 {dimension_numbers = #tpu.dot_dimension_numbers<[1], [0], [0], [1], [0, 0, 1, 1], [], []>} : vector<8x8xf32>, vector<8x8xf32>, vector<8x8xf32> -> vector<8x8xf32>
    %154 = tpu.concatenate %93, %113, %133, %153 in 1 : vector<8x8xf32>, vector<8x8xf32>, vector<8x8xf32>, vector<8x8xf32> -> vector<8x32xf32>
    %cst_53 = arith.constant dense<0.000000e+00> : vector<8x32xf32>
    %155 = tpu.matmul %154, %61, %cst_53 {dimension_numbers = #tpu.dot_dimension_numbers<[1], [0], [0], [1], [0, 0, 1, 1], [], []>} : vector<8x32xf32>, vector<32x32xf32>, vector<8x32xf32> -> vector<8x32xf32>
    %156 = vector.broadcast %64 : vector<1x32xf32> to vector<8x32xf32>
    %157 = arith.addf %155, %156 : vector<8x32xf32>
    %158 = arith.addf %50, %157 : vector<8x32xf32>
    %cst_54 = arith.constant dense<0.000000e+00> : vector<8xf32>
    %159 = vector.multi_reduction <add>, %158, %cst_54 [1] : vector<8x32xf32> to vector<8xf32>
    %160 = vector.shape_cast %159 : vector<8xf32> to vector<8x1xf32>
    %cst_55 = arith.constant 3.200000e+01 : f32
    %161 = vector.broadcast %cst_55 : f32 to vector<8x1xf32>
    %162 = arith.divf %160, %161 : vector<8x1xf32>
    %163 = vector.broadcast %162 : vector<8x1xf32> to vector<8x32xf32>
    %164 = arith.subf %158, %163 : vector<8x32xf32>
    %165 = arith.mulf %164, %164 : vector<8x32xf32>
    %cst_56 = arith.constant dense<0.000000e+00> : vector<8xf32>
    %166 = vector.multi_reduction <add>, %165, %cst_56 [1] : vector<8x32xf32> to vector<8xf32>
    %167 = vector.shape_cast %166 : vector<8xf32> to vector<8x1xf32>
    %cst_57 = arith.constant 3.200000e+01 : f32
    %168 = vector.broadcast %cst_57 : f32 to vector<8x1xf32>
    %169 = arith.divf %167, %168 : vector<8x1xf32>
    %170 = vector.broadcast %162 : vector<8x1xf32> to vector<8x32xf32>
    %171 = arith.subf %158, %170 : vector<8x32xf32>
    %cst_58 = arith.constant 9.99999974E-6 : f32
    %172 = vector.broadcast %cst_58 : f32 to vector<8x1xf32>
    %173 = arith.addf %169, %172 : vector<8x1xf32>
    %174 = math.rsqrt %173 : vector<8x1xf32>
    %175 = vector.broadcast %174 : vector<8x1xf32> to vector<8x32xf32>
    %176 = arith.mulf %171, %175 : vector<8x32xf32>
    %177 = vector.broadcast %67 : vector<1x32xf32> to vector<8x32xf32>
    %178 = arith.mulf %176, %177 : vector<8x32xf32>
    %179 = vector.broadcast %68 : vector<1x32xf32> to vector<8x32xf32>
    %180 = arith.addf %178, %179 : vector<8x32xf32>
    %cst_59 = arith.constant dense<0.000000e+00> : vector<8x64xf32>
    %181 = tpu.matmul %180, %62, %cst_59 {dimension_numbers = #tpu.dot_dimension_numbers<[1], [0], [0], [1], [0, 0, 1, 1], [], []>} : vector<8x32xf32>, vector<32x64xf32>, vector<8x64xf32> -> vector<8x64xf32>
    %182 = vector.broadcast %65 : vector<1x64xf32> to vector<8x64xf32>
    %183 = arith.addf %181, %182 : vector<8x64xf32>
    %cst_60 = arith.constant 0.000000e+00 : f32
    %184 = vector.broadcast %cst_60 : f32 to vector<8x64xf32>
    %185 = arith.maximumf %183, %184 : vector<8x64xf32>
    %186 = vector.extract_strided_slice %185 {offsets = [0, 0], sizes = [8, 32], strides = [1, 1]} : vector<8x64xf32> to vector<8x32xf32>
    %187 = vector.extract_strided_slice %57 {offsets = [0, 192], sizes = [32, 32], strides = [1, 1]} : vector<32x256xf32> to vector<32x32xf32>
    %cst_61 = arith.constant dense<0.000000e+00> : vector<8x32xf32>
    %188 = tpu.matmul %186, %187, %cst_61 {dimension_numbers = #tpu.dot_dimension_numbers<[1], [0], [0], [1], [0, 0, 1, 1], [], []>} : vector<8x32xf32>, vector<32x32xf32>, vector<8x32xf32> -> vector<8x32xf32>
    %189 = vector.extract_strided_slice %185 {offsets = [0, 32], sizes = [8, 32], strides = [1, 1]} : vector<8x64xf32> to vector<8x32xf32>
    %190 = vector.extract_strided_slice %57 {offsets = [0, 224], sizes = [32, 32], strides = [1, 1]} : vector<32x256xf32> to vector<32x32xf32>
    %cst_62 = arith.constant dense<0.000000e+00> : vector<8x32xf32>
    %191 = tpu.matmul %189, %190, %cst_62 {dimension_numbers = #tpu.dot_dimension_numbers<[1], [0], [0], [1], [0, 0, 1, 1], [], []>} : vector<8x32xf32>, vector<32x32xf32>, vector<8x32xf32> -> vector<8x32xf32>
    %cst_63 = arith.constant 0.000000e+00 : f32
    %192 = vector.broadcast %cst_63 : f32 to vector<8x32xf32>
    %193 = arith.addf %192, %188 : vector<8x32xf32>
    %194 = arith.addf %193, %191 : vector<8x32xf32>
    %195 = vector.broadcast %66 : vector<1x32xf32> to vector<8x32xf32>
    %196 = arith.addf %194, %195 : vector<8x32xf32>
    %197 = arith.addf %180, %196 : vector<8x32xf32>
    %cst_64 = arith.constant dense<0.000000e+00> : vector<8xf32>
    %198 = vector.multi_reduction <add>, %197, %cst_64 [1] : vector<8x32xf32> to vector<8xf32>
    %199 = vector.shape_cast %198 : vector<8xf32> to vector<8x1xf32>
    %cst_65 = arith.constant 3.200000e+01 : f32
    %200 = vector.broadcast %cst_65 : f32 to vector<8x1xf32>
    %201 = arith.divf %199, %200 : vector<8x1xf32>
    %202 = vector.broadcast %201 : vector<8x1xf32> to vector<8x32xf32>
    %203 = arith.subf %197, %202 : vector<8x32xf32>
    %204 = arith.mulf %203, %203 : vector<8x32xf32>
    %cst_66 = arith.constant dense<0.000000e+00> : vector<8xf32>
    %205 = vector.multi_reduction <add>, %204, %cst_66 [1] : vector<8x32xf32> to vector<8xf32>
    %206 = vector.shape_cast %205 : vector<8xf32> to vector<8x1xf32>
    %cst_67 = arith.constant 3.200000e+01 : f32
    %207 = vector.broadcast %cst_67 : f32 to vector<8x1xf32>
    %208 = arith.divf %206, %207 : vector<8x1xf32>
    %209 = vector.broadcast %201 : vector<8x1xf32> to vector<8x32xf32>
    %210 = arith.subf %197, %209 : vector<8x32xf32>
    %cst_68 = arith.constant 9.99999974E-6 : f32
    %211 = vector.broadcast %cst_68 : f32 to vector<8x1xf32>
    %212 = arith.addf %208, %211 : vector<8x1xf32>
    %213 = math.rsqrt %212 : vector<8x1xf32>
    %214 = vector.broadcast %213 : vector<8x1xf32> to vector<8x32xf32>
    %215 = arith.mulf %210, %214 : vector<8x32xf32>
    %216 = vector.broadcast %69 : vector<1x32xf32> to vector<8x32xf32>
    %217 = arith.mulf %215, %216 : vector<8x32xf32>
    %218 = vector.broadcast %70 : vector<1x32xf32> to vector<8x32xf32>
    %219 = arith.addf %217, %218 : vector<8x32xf32>
    %c1_69 = arith.constant 1 : index
    %c0_70 = arith.constant 0 : index
    %c0_71 = arith.constant 0 : index
    %220 = vector.load %arg6[%c1_69, %c0_70, %c0_71] : memref<2x32x256xf32, #tpu.memory_space<vmem>>, vector<1x32x256xf32>
    %221 = vector.shape_cast %220 : vector<1x32x256xf32> to vector<32x256xf32>
    %c1_72 = arith.constant 1 : index
    %c0_73 = arith.constant 0 : index
    %c0_74 = arith.constant 0 : index
    %222 = vector.load %arg7[%c1_72, %c0_73, %c0_74] : memref<2x8x128xf32, #tpu.memory_space<vmem>>, vector<1x8x128xf32>
    %223 = vector.shape_cast %222 : vector<1x8x128xf32> to vector<8x128xf32>
    %224 = vector.extract_strided_slice %221 {offsets = [0, 0], sizes = [32, 96], strides = [1, 1]} : vector<32x256xf32> to vector<32x96xf32>
    %225 = vector.extract_strided_slice %221 {offsets = [0, 96], sizes = [32, 32], strides = [1, 1]} : vector<32x256xf32> to vector<32x32xf32>
    %226 = vector.extract_strided_slice %221 {offsets = [0, 128], sizes = [32, 64], strides = [1, 1]} : vector<32x256xf32> to vector<32x64xf32>
    %227 = vector.extract_strided_slice %223 {offsets = [0, 0], sizes = [1, 96], strides = [1, 1]} : vector<8x128xf32> to vector<1x96xf32>
    %228 = vector.extract_strided_slice %223 {offsets = [0, 96], sizes = [1, 32], strides = [1, 1]} : vector<8x128xf32> to vector<1x32xf32>
    %229 = vector.extract_strided_slice %223 {offsets = [1, 0], sizes = [1, 64], strides = [1, 1]} : vector<8x128xf32> to vector<1x64xf32>
    %230 = vector.extract_strided_slice %223 {offsets = [1, 64], sizes = [1, 32], strides = [1, 1]} : vector<8x128xf32> to vector<1x32xf32>
    %231 = vector.extract_strided_slice %223 {offsets = [2, 0], sizes = [1, 32], strides = [1, 1]} : vector<8x128xf32> to vector<1x32xf32>
    %232 = vector.extract_strided_slice %223 {offsets = [2, 32], sizes = [1, 32], strides = [1, 1]} : vector<8x128xf32> to vector<1x32xf32>
    %233 = vector.extract_strided_slice %223 {offsets = [2, 64], sizes = [1, 32], strides = [1, 1]} : vector<8x128xf32> to vector<1x32xf32>
    %234 = vector.extract_strided_slice %223 {offsets = [2, 96], sizes = [1, 32], strides = [1, 1]} : vector<8x128xf32> to vector<1x32xf32>
    %cst_75 = arith.constant dense<0.000000e+00> : vector<8x96xf32>
    %235 = tpu.matmul %219, %224, %cst_75 {dimension_numbers = #tpu.dot_dimension_numbers<[1], [0], [0], [1], [0, 0, 1, 1], [], []>} : vector<8x32xf32>, vector<32x96xf32>, vector<8x96xf32> -> vector<8x96xf32>
    %236 = vector.broadcast %227 : vector<1x96xf32> to vector<8x96xf32>
    %237 = arith.addf %235, %236 : vector<8x96xf32>
    %238 = vector.extract_strided_slice %237 {offsets = [0, 0], sizes = [8, 8], strides = [1, 1]} : vector<8x96xf32> to vector<8x8xf32>
    %239 = vector.extract_strided_slice %237 {offsets = [0, 32], sizes = [8, 8], strides = [1, 1]} : vector<8x96xf32> to vector<8x8xf32>
    %240 = vector.extract_strided_slice %237 {offsets = [0, 64], sizes = [8, 8], strides = [1, 1]} : vector<8x96xf32> to vector<8x8xf32>
    %241 = tpu.transpose %239, [1, 0] : vector<8x8xf32> -> vector<8x8xf32>
    %cst_76 = arith.constant dense<0.000000e+00> : vector<8x8xf32>
    %242 = tpu.matmul %238, %241, %cst_76 {dimension_numbers = #tpu.dot_dimension_numbers<[1], [0], [0], [1], [0, 0, 1, 1], [], []>} : vector<8x8xf32>, vector<8x8xf32>, vector<8x8xf32> -> vector<8x8xf32>
    %cst_77 = arith.constant 0.353553385 : f32
    %243 = vector.broadcast %cst_77 : f32 to vector<8x8xf32>
    %244 = arith.mulf %242, %243 : vector<8x8xf32>
    %cst_78 = arith.constant -1.000000e+06 : f32
    %245 = vector.broadcast %cst_78 : f32 to vector<8x8xf32>
    %246 = arith.select %55, %244, %245 : vector<8x8xi1>, vector<8x8xf32>
    %cst_79 = arith.constant dense<0xFF800000> : vector<8xf32>
    %247 = vector.multi_reduction <maximumf>, %246, %cst_79 [1] : vector<8x8xf32> to vector<8xf32>
    %248 = vector.shape_cast %247 : vector<8xf32> to vector<8x1xf32>
    %249 = vector.broadcast %248 : vector<8x1xf32> to vector<8x8xf32>
    %250 = arith.subf %246, %249 : vector<8x8xf32>
    %251 = math.exp %250 : vector<8x8xf32>
    %cst_80 = arith.constant dense<0.000000e+00> : vector<8xf32>
    %252 = vector.multi_reduction <add>, %251, %cst_80 [1] : vector<8x8xf32> to vector<8xf32>
    %253 = vector.shape_cast %252 : vector<8xf32> to vector<8x1xf32>
    %254 = tpu.reciprocal %253 {approx = true} : vector<8x1xf32> -> vector<8x1xf32>
    %255 = vector.broadcast %254 : vector<8x1xf32> to vector<8x8xf32>
    %256 = arith.mulf %251, %255 : vector<8x8xf32>
    %cst_81 = arith.constant dense<0.000000e+00> : vector<8x8xf32>
    %257 = tpu.matmul %256, %240, %cst_81 {dimension_numbers = #tpu.dot_dimension_numbers<[1], [0], [0], [1], [0, 0, 1, 1], [], []>} : vector<8x8xf32>, vector<8x8xf32>, vector<8x8xf32> -> vector<8x8xf32>
    %258 = vector.extract_strided_slice %237 {offsets = [0, 8], sizes = [8, 8], strides = [1, 1]} : vector<8x96xf32> to vector<8x8xf32>
    %259 = vector.extract_strided_slice %237 {offsets = [0, 40], sizes = [8, 8], strides = [1, 1]} : vector<8x96xf32> to vector<8x8xf32>
    %260 = vector.extract_strided_slice %237 {offsets = [0, 72], sizes = [8, 8], strides = [1, 1]} : vector<8x96xf32> to vector<8x8xf32>
    %261 = tpu.transpose %259, [1, 0] : vector<8x8xf32> -> vector<8x8xf32>
    %cst_82 = arith.constant dense<0.000000e+00> : vector<8x8xf32>
    %262 = tpu.matmul %258, %261, %cst_82 {dimension_numbers = #tpu.dot_dimension_numbers<[1], [0], [0], [1], [0, 0, 1, 1], [], []>} : vector<8x8xf32>, vector<8x8xf32>, vector<8x8xf32> -> vector<8x8xf32>
    %cst_83 = arith.constant 0.353553385 : f32
    %263 = vector.broadcast %cst_83 : f32 to vector<8x8xf32>
    %264 = arith.mulf %262, %263 : vector<8x8xf32>
    %cst_84 = arith.constant -1.000000e+06 : f32
    %265 = vector.broadcast %cst_84 : f32 to vector<8x8xf32>
    %266 = arith.select %55, %264, %265 : vector<8x8xi1>, vector<8x8xf32>
    %cst_85 = arith.constant dense<0xFF800000> : vector<8xf32>
    %267 = vector.multi_reduction <maximumf>, %266, %cst_85 [1] : vector<8x8xf32> to vector<8xf32>
    %268 = vector.shape_cast %267 : vector<8xf32> to vector<8x1xf32>
    %269 = vector.broadcast %268 : vector<8x1xf32> to vector<8x8xf32>
    %270 = arith.subf %266, %269 : vector<8x8xf32>
    %271 = math.exp %270 : vector<8x8xf32>
    %cst_86 = arith.constant dense<0.000000e+00> : vector<8xf32>
    %272 = vector.multi_reduction <add>, %271, %cst_86 [1] : vector<8x8xf32> to vector<8xf32>
    %273 = vector.shape_cast %272 : vector<8xf32> to vector<8x1xf32>
    %274 = tpu.reciprocal %273 {approx = true} : vector<8x1xf32> -> vector<8x1xf32>
    %275 = vector.broadcast %274 : vector<8x1xf32> to vector<8x8xf32>
    %276 = arith.mulf %271, %275 : vector<8x8xf32>
    %cst_87 = arith.constant dense<0.000000e+00> : vector<8x8xf32>
    %277 = tpu.matmul %276, %260, %cst_87 {dimension_numbers = #tpu.dot_dimension_numbers<[1], [0], [0], [1], [0, 0, 1, 1], [], []>} : vector<8x8xf32>, vector<8x8xf32>, vector<8x8xf32> -> vector<8x8xf32>
    %278 = vector.extract_strided_slice %237 {offsets = [0, 16], sizes = [8, 8], strides = [1, 1]} : vector<8x96xf32> to vector<8x8xf32>
    %279 = vector.extract_strided_slice %237 {offsets = [0, 48], sizes = [8, 8], strides = [1, 1]} : vector<8x96xf32> to vector<8x8xf32>
    %280 = vector.extract_strided_slice %237 {offsets = [0, 80], sizes = [8, 8], strides = [1, 1]} : vector<8x96xf32> to vector<8x8xf32>
    %281 = tpu.transpose %279, [1, 0] : vector<8x8xf32> -> vector<8x8xf32>
    %cst_88 = arith.constant dense<0.000000e+00> : vector<8x8xf32>
    %282 = tpu.matmul %278, %281, %cst_88 {dimension_numbers = #tpu.dot_dimension_numbers<[1], [0], [0], [1], [0, 0, 1, 1], [], []>} : vector<8x8xf32>, vector<8x8xf32>, vector<8x8xf32> -> vector<8x8xf32>
    %cst_89 = arith.constant 0.353553385 : f32
    %283 = vector.broadcast %cst_89 : f32 to vector<8x8xf32>
    %284 = arith.mulf %282, %283 : vector<8x8xf32>
    %cst_90 = arith.constant -1.000000e+06 : f32
    %285 = vector.broadcast %cst_90 : f32 to vector<8x8xf32>
    %286 = arith.select %55, %284, %285 : vector<8x8xi1>, vector<8x8xf32>
    %cst_91 = arith.constant dense<0xFF800000> : vector<8xf32>
    %287 = vector.multi_reduction <maximumf>, %286, %cst_91 [1] : vector<8x8xf32> to vector<8xf32>
    %288 = vector.shape_cast %287 : vector<8xf32> to vector<8x1xf32>
    %289 = vector.broadcast %288 : vector<8x1xf32> to vector<8x8xf32>
    %290 = arith.subf %286, %289 : vector<8x8xf32>
    %291 = math.exp %290 : vector<8x8xf32>
    %cst_92 = arith.constant dense<0.000000e+00> : vector<8xf32>
    %292 = vector.multi_reduction <add>, %291, %cst_92 [1] : vector<8x8xf32> to vector<8xf32>
    %293 = vector.shape_cast %292 : vector<8xf32> to vector<8x1xf32>
    %294 = tpu.reciprocal %293 {approx = true} : vector<8x1xf32> -> vector<8x1xf32>
    %295 = vector.broadcast %294 : vector<8x1xf32> to vector<8x8xf32>
    %296 = arith.mulf %291, %295 : vector<8x8xf32>
    %cst_93 = arith.constant dense<0.000000e+00> : vector<8x8xf32>
    %297 = tpu.matmul %296, %280, %cst_93 {dimension_numbers = #tpu.dot_dimension_numbers<[1], [0], [0], [1], [0, 0, 1, 1], [], []>} : vector<8x8xf32>, vector<8x8xf32>, vector<8x8xf32> -> vector<8x8xf32>
    %298 = vector.extract_strided_slice %237 {offsets = [0, 24], sizes = [8, 8], strides = [1, 1]} : vector<8x96xf32> to vector<8x8xf32>
    %299 = vector.extract_strided_slice %237 {offsets = [0, 56], sizes = [8, 8], strides = [1, 1]} : vector<8x96xf32> to vector<8x8xf32>
    %300 = vector.extract_strided_slice %237 {offsets = [0, 88], sizes = [8, 8], strides = [1, 1]} : vector<8x96xf32> to vector<8x8xf32>
    %301 = tpu.transpose %299, [1, 0] : vector<8x8xf32> -> vector<8x8xf32>
    %cst_94 = arith.constant dense<0.000000e+00> : vector<8x8xf32>
    %302 = tpu.matmul %298, %301, %cst_94 {dimension_numbers = #tpu.dot_dimension_numbers<[1], [0], [0], [1], [0, 0, 1, 1], [], []>} : vector<8x8xf32>, vector<8x8xf32>, vector<8x8xf32> -> vector<8x8xf32>
    %cst_95 = arith.constant 0.353553385 : f32
    %303 = vector.broadcast %cst_95 : f32 to vector<8x8xf32>
    %304 = arith.mulf %302, %303 : vector<8x8xf32>
    %cst_96 = arith.constant -1.000000e+06 : f32
    %305 = vector.broadcast %cst_96 : f32 to vector<8x8xf32>
    %306 = arith.select %55, %304, %305 : vector<8x8xi1>, vector<8x8xf32>
    %cst_97 = arith.constant dense<0xFF800000> : vector<8xf32>
    %307 = vector.multi_reduction <maximumf>, %306, %cst_97 [1] : vector<8x8xf32> to vector<8xf32>
    %308 = vector.shape_cast %307 : vector<8xf32> to vector<8x1xf32>
    %309 = vector.broadcast %308 : vector<8x1xf32> to vector<8x8xf32>
    %310 = arith.subf %306, %309 : vector<8x8xf32>
    %311 = math.exp %310 : vector<8x8xf32>
    %cst_98 = arith.constant dense<0.000000e+00> : vector<8xf32>
    %312 = vector.multi_reduction <add>, %311, %cst_98 [1] : vector<8x8xf32> to vector<8xf32>
    %313 = vector.shape_cast %312 : vector<8xf32> to vector<8x1xf32>
    %314 = tpu.reciprocal %313 {approx = true} : vector<8x1xf32> -> vector<8x1xf32>
    %315 = vector.broadcast %314 : vector<8x1xf32> to vector<8x8xf32>
    %316 = arith.mulf %311, %315 : vector<8x8xf32>
    %cst_99 = arith.constant dense<0.000000e+00> : vector<8x8xf32>
    %317 = tpu.matmul %316, %300, %cst_99 {dimension_numbers = #tpu.dot_dimension_numbers<[1], [0], [0], [1], [0, 0, 1, 1], [], []>} : vector<8x8xf32>, vector<8x8xf32>, vector<8x8xf32> -> vector<8x8xf32>
    %318 = tpu.concatenate %257, %277, %297, %317 in 1 : vector<8x8xf32>, vector<8x8xf32>, vector<8x8xf32>, vector<8x8xf32> -> vector<8x32xf32>
    %cst_100 = arith.constant dense<0.000000e+00> : vector<8x32xf32>
    %319 = tpu.matmul %318, %225, %cst_100 {dimension_numbers = #tpu.dot_dimension_numbers<[1], [0], [0], [1], [0, 0, 1, 1], [], []>} : vector<8x32xf32>, vector<32x32xf32>, vector<8x32xf32> -> vector<8x32xf32>
    %320 = vector.broadcast %228 : vector<1x32xf32> to vector<8x32xf32>
    %321 = arith.addf %319, %320 : vector<8x32xf32>
    %322 = arith.addf %219, %321 : vector<8x32xf32>
    %cst_101 = arith.constant dense<0.000000e+00> : vector<8xf32>
    %323 = vector.multi_reduction <add>, %322, %cst_101 [1] : vector<8x32xf32> to vector<8xf32>
    %324 = vector.shape_cast %323 : vector<8xf32> to vector<8x1xf32>
    %cst_102 = arith.constant 3.200000e+01 : f32
    %325 = vector.broadcast %cst_102 : f32 to vector<8x1xf32>
    %326 = arith.divf %324, %325 : vector<8x1xf32>
    %327 = vector.broadcast %326 : vector<8x1xf32> to vector<8x32xf32>
    %328 = arith.subf %322, %327 : vector<8x32xf32>
    %329 = arith.mulf %328, %328 : vector<8x32xf32>
    %cst_103 = arith.constant dense<0.000000e+00> : vector<8xf32>
    %330 = vector.multi_reduction <add>, %329, %cst_103 [1] : vector<8x32xf32> to vector<8xf32>
    %331 = vector.shape_cast %330 : vector<8xf32> to vector<8x1xf32>
    %cst_104 = arith.constant 3.200000e+01 : f32
    %332 = vector.broadcast %cst_104 : f32 to vector<8x1xf32>
    %333 = arith.divf %331, %332 : vector<8x1xf32>
    %334 = vector.broadcast %326 : vector<8x1xf32> to vector<8x32xf32>
    %335 = arith.subf %322, %334 : vector<8x32xf32>
    %cst_105 = arith.constant 9.99999974E-6 : f32
    %336 = vector.broadcast %cst_105 : f32 to vector<8x1xf32>
    %337 = arith.addf %333, %336 : vector<8x1xf32>
    %338 = math.rsqrt %337 : vector<8x1xf32>
    %339 = vector.broadcast %338 : vector<8x1xf32> to vector<8x32xf32>
    %340 = arith.mulf %335, %339 : vector<8x32xf32>
    %341 = vector.broadcast %231 : vector<1x32xf32> to vector<8x32xf32>
    %342 = arith.mulf %340, %341 : vector<8x32xf32>
    %343 = vector.broadcast %232 : vector<1x32xf32> to vector<8x32xf32>
    %344 = arith.addf %342, %343 : vector<8x32xf32>
    %cst_106 = arith.constant dense<0.000000e+00> : vector<8x64xf32>
    %345 = tpu.matmul %344, %226, %cst_106 {dimension_numbers = #tpu.dot_dimension_numbers<[1], [0], [0], [1], [0, 0, 1, 1], [], []>} : vector<8x32xf32>, vector<32x64xf32>, vector<8x64xf32> -> vector<8x64xf32>
    %346 = vector.broadcast %229 : vector<1x64xf32> to vector<8x64xf32>
    %347 = arith.addf %345, %346 : vector<8x64xf32>
    %cst_107 = arith.constant 0.000000e+00 : f32
    %348 = vector.broadcast %cst_107 : f32 to vector<8x64xf32>
    %349 = arith.maximumf %347, %348 : vector<8x64xf32>
    %350 = vector.extract_strided_slice %349 {offsets = [0, 0], sizes = [8, 32], strides = [1, 1]} : vector<8x64xf32> to vector<8x32xf32>
    %351 = vector.extract_strided_slice %221 {offsets = [0, 192], sizes = [32, 32], strides = [1, 1]} : vector<32x256xf32> to vector<32x32xf32>
    %cst_108 = arith.constant dense<0.000000e+00> : vector<8x32xf32>
    %352 = tpu.matmul %350, %351, %cst_108 {dimension_numbers = #tpu.dot_dimension_numbers<[1], [0], [0], [1], [0, 0, 1, 1], [], []>} : vector<8x32xf32>, vector<32x32xf32>, vector<8x32xf32> -> vector<8x32xf32>
    %353 = vector.extract_strided_slice %349 {offsets = [0, 32], sizes = [8, 32], strides = [1, 1]} : vector<8x64xf32> to vector<8x32xf32>
    %354 = vector.extract_strided_slice %221 {offsets = [0, 224], sizes = [32, 32], strides = [1, 1]} : vector<32x256xf32> to vector<32x32xf32>
    %cst_109 = arith.constant dense<0.000000e+00> : vector<8x32xf32>
    %355 = tpu.matmul %353, %354, %cst_109 {dimension_numbers = #tpu.dot_dimension_numbers<[1], [0], [0], [1], [0, 0, 1, 1], [], []>} : vector<8x32xf32>, vector<32x32xf32>, vector<8x32xf32> -> vector<8x32xf32>
    %cst_110 = arith.constant 0.000000e+00 : f32
    %356 = vector.broadcast %cst_110 : f32 to vector<8x32xf32>
    %357 = arith.addf %356, %352 : vector<8x32xf32>
    %358 = arith.addf %357, %355 : vector<8x32xf32>
    %359 = vector.broadcast %230 : vector<1x32xf32> to vector<8x32xf32>
    %360 = arith.addf %358, %359 : vector<8x32xf32>
    %361 = arith.addf %344, %360 : vector<8x32xf32>
    %cst_111 = arith.constant dense<0.000000e+00> : vector<8xf32>
    %362 = vector.multi_reduction <add>, %361, %cst_111 [1] : vector<8x32xf32> to vector<8xf32>
    %363 = vector.shape_cast %362 : vector<8xf32> to vector<8x1xf32>
    %cst_112 = arith.constant 3.200000e+01 : f32
    %364 = vector.broadcast %cst_112 : f32 to vector<8x1xf32>
    %365 = arith.divf %363, %364 : vector<8x1xf32>
    %366 = vector.broadcast %365 : vector<8x1xf32> to vector<8x32xf32>
    %367 = arith.subf %361, %366 : vector<8x32xf32>
    %368 = arith.mulf %367, %367 : vector<8x32xf32>
    %cst_113 = arith.constant dense<0.000000e+00> : vector<8xf32>
    %369 = vector.multi_reduction <add>, %368, %cst_113 [1] : vector<8x32xf32> to vector<8xf32>
    %370 = vector.shape_cast %369 : vector<8xf32> to vector<8x1xf32>
    %cst_114 = arith.constant 3.200000e+01 : f32
    %371 = vector.broadcast %cst_114 : f32 to vector<8x1xf32>
    %372 = arith.divf %370, %371 : vector<8x1xf32>
    %373 = vector.broadcast %365 : vector<8x1xf32> to vector<8x32xf32>
    %374 = arith.subf %361, %373 : vector<8x32xf32>
    %cst_115 = arith.constant 9.99999974E-6 : f32
    %375 = vector.broadcast %cst_115 : f32 to vector<8x1xf32>
    %376 = arith.addf %372, %375 : vector<8x1xf32>
    %377 = math.rsqrt %376 : vector<8x1xf32>
    %378 = vector.broadcast %377 : vector<8x1xf32> to vector<8x32xf32>
    %379 = arith.mulf %374, %378 : vector<8x32xf32>
    %380 = vector.broadcast %233 : vector<1x32xf32> to vector<8x32xf32>
    %381 = arith.mulf %379, %380 : vector<8x32xf32>
    %382 = vector.broadcast %234 : vector<1x32xf32> to vector<8x32xf32>
    %383 = arith.addf %381, %382 : vector<8x32xf32>
    %c0_116 = arith.constant 0 : index
    %c0_117 = arith.constant 0 : index
    %c0_118 = arith.constant 0 : index
    %384 = vector.load %arg8[%c0_116, %c0_117, %c0_118] : memref<1x8x32xf32, #tpu.memory_space<vmem>>, vector<1x8x32xf32>
    %385 = vector.shape_cast %384 : vector<1x8x32xf32> to vector<8x32xf32>
    %386 = vector.shape_cast %383 : vector<8x32xf32> to vector<1x8x32xf32>
    tpu.vector_store %arg8[%c0_116, %c0_117, %c0_118], %386 {strides = array<i32>} : memref<1x8x32xf32, #tpu.memory_space<vmem>>, vector<1x8x32xf32>,
    return
  }
  func.func @transform_0(%arg0: i32, %arg1: memref<2xi32, #tpu.memory_space<smem>>, %arg2: memref<2x8xi32, #tpu.memory_space<smem>>) -> (i32, i32, i32) {
    %c0_i32 = arith.constant 0 : i32
    %c0_i32_0 = arith.constant 0 : i32
    %c0_i32_1 = arith.constant 0 : i32
    return %arg0, %c0_i32, %c0_i32_0 : i32, i32, i32
  }
  func.func @transform_1(%arg0: i32, %arg1: memref<2xi32, #tpu.memory_space<smem>>, %arg2: memref<2x8xi32, #tpu.memory_space<smem>>) -> (i32, i32, i32) {
    %c0_i32 = arith.constant 0 : i32
    %c0_i32_0 = arith.constant 0 : i32
    %c0_i32_1 = arith.constant 0 : i32
    %c0_i32_2 = arith.constant 0 : i32
    return %c0_i32, %c0_i32_0, %c0_i32_1 : i32, i32, i32
  }
  func.func @transform_2(%arg0: i32, %arg1: memref<2xi32, #tpu.memory_space<smem>>, %arg2: memref<2x8xi32, #tpu.memory_space<smem>>) -> (i32, i32) {
    %c0_i32 = arith.constant 0 : i32
    %c0_i32_0 = arith.constant 0 : i32
    %c0_i32_1 = arith.constant 0 : i32
    return %c0_i32, %c0_i32_0 : i32, i32
  }
  func.func @transform_3(%arg0: i32, %arg1: memref<2xi32, #tpu.memory_space<smem>>, %arg2: memref<2x8xi32, #tpu.memory_space<smem>>) -> (i32, i32, i32) {
    %c0_i32 = arith.constant 0 : i32
    %c0_i32_0 = arith.constant 0 : i32
    %c0_i32_1 = arith.constant 0 : i32
    %c0_i32_2 = arith.constant 0 : i32
    return %c0_i32, %c0_i32_0, %c0_i32_1 : i32, i32, i32
  }
  func.func @transform_4(%arg0: i32, %arg1: memref<2xi32, #tpu.memory_space<smem>>, %arg2: memref<2x8xi32, #tpu.memory_space<smem>>) -> (i32, i32, i32) {
    %c0_i32 = arith.constant 0 : i32
    %c0_i32_0 = arith.constant 0 : i32
    %c0_i32_1 = arith.constant 0 : i32
    %c0_i32_2 = arith.constant 0 : i32
    return %c0_i32, %c0_i32_0, %c0_i32_1 : i32, i32, i32
  }
  func.func @transform_5(%arg0: i32, %arg1: memref<2xi32, #tpu.memory_space<smem>>, %arg2: memref<2x8xi32, #tpu.memory_space<smem>>) -> (i32, i32, i32) {
    %c0_i32 = arith.constant 0 : i32
    %c0_i32_0 = arith.constant 0 : i32
    %c0_i32_1 = arith.constant 0 : i32
    return %arg0, %c0_i32, %c0_i32_0 : i32, i32, i32
  }
}

</mosaic_0001>

<bundles_post_ra>
// kernel: tpu_custom_call.1
= control target key start
LH: loop header
LB: loop body
LE: loop exit
PB: predicated region body
PF: predicated region fallthrough
CT: control target
= control target key end

     0   :  { %s1988_s30 = smov [#allocation3]   ;;  %s1989_s8 = smov [#allocation4]   ;;  %s2481_s0 = inlined_call_operand.hbm [shape: s32[2], index: 0, kind: input, shape index: {}]   ;;  %s2482_s2 = inlined_call_operand.vmem [shape: f32[2,8,1], index: 2, kind: input, shape index: {}]   ;;  %s2483_s3 = inlined_call_operand.vmem [shape: f32[20,1,32], index: 3, kind: input, shape index: {}]   ;;  %s2484_s4 = inlined_call_operand.hbm [shape: f32[2,32], index: 4, kind: input, shape index: {}]   ;;  %s2485_s5 = inlined_call_operand.hbm [shape: f32[2,32,256], index: 5, kind: input, shape index: {}]   ;;  %s2486_s6 = inlined_call_operand.hbm [shape: f32[2,8,128], index: 6, kind: input, shape index: {}]   ;;  %s2487_s7 = inlined_call_operand.hbm [shape: f32[2,8,32], index: 7, kind: output, shape index: {}]   ;;  %s2488_s1 = inlined_call_operand.hbm [shape: s32[2,8], index: 1, kind: input, shape index: {}]  }
   0x1   :  { %2493 = sst [smem:[#allocation20_spill]] %s2482_s2  ;;  %s13_s26 = sshll.u32 %s2481_s0, 4  ;;  %s14_s26 = int_to_ptr.hbm [resolvable:$true] %s13_s26 }
   0x2   :  { %2494 = sst [smem:[#allocation21_spill]] %s2484_s4  ;;  %s18_s29 = sshll.u32 %s2488_s1, 4  ;;  %s19_s29 = int_to_ptr.hbm [resolvable:$true] %s18_s29 }
   0x3   :  { %2495 = sst [smem:[#allocation22_spill]] %s2485_s5 }
   0x4   :  { %2496 = sst [smem:[#allocation23_spill]] %s2486_s6 }
   0x5   :  { %16 = dma.hbm_to_smem %s14_s26, 16, %s1988_s30, [#allocation2] }
   0x6   :  { %21 = dma.hbm_to_smem %s19_s29, 32, %s1989_s8, [#allocation2] }
   0x7   :  { %1958 = dma.done.wait [#allocation2], 48 }
   0x8   :  { %1959 = vsyncadd [#allocation2], 4294967248 }
   0x9   :  { %24 = sfence }
   0xa   :  { %25 = vsyncpa [#allocation6], 0 }
   0xb   :  { %26 = vsyncpa [#allocation9], 0 }
   0xc   :  { %27 = vsyncpa [#allocation7], 0 }
   0xd   :  { %29 = vsyncpa [#allocation7 + $0x1], 0  ;;  %s2060_s9 = smov 0   ;;  %s2062_s0 = smov 0  }
   0xe   :  { %s2064_s10 = smov 0   ;;  %s2066_s1 = smov 0  }
   0xf LB: > { %2497 = sst [smem:[#allocation16_spill]] %s1982_s10  ;;  %s2081_s11 = sadd.s32 4294967295, %s1986_s1   ;;  %s1986_s1 = sphi %s2066_s1, %s2512_s1   ;;  %s1982_s10 = sphi %s2064_s10, %s2514_s10   ;;  %s1978_s0 = sphi %s2062_s0, %s2516_s0   ;;  %s1974_s9 = sphi %s2060_s9, %s2515_s9  }
  0x10   : > { %s1544_s12 = sadd.s32 4294967294, %s1986_s1   ;;  %s2085_s13 = sadd.s32 1, %s1986_s1  }
  0x11   : > { %2498 = sst [smem:[#allocation17_spill]] %s2085_s13  ;;  %s152_s14 = sadd.s32 1, %s1982_s10 }
  0x12   : > { %s149_s15 = ssub.s32 %s1986_s1, %s2085_s13  ;;  %p162_p0 = scmp.ne.s32.totalorder %s1982_s10, %s1978_s0 }
  0x13   : > { %p150_p1 = scmp.eq.s32.totalorder %s149_s15, 0  ;;  %p163_p2 = scmp.eq.s32.totalorder %s2081_s11, 1 }
  0x14   : > { %p168_p3 = scmp.ne.s32.totalorder %s1978_s0, %s1974_s9  ;;  %p169_p4 = scmp.eq.s32.totalorder %s1544_s12, 1 }
  0x15   : > { %s2096_s16 = scalar_select %p150_p1, %s1982_s10, %s152_s14  }
  0x16   : > { %p2098_p5 = por %p163_p2, %p162_p0  ;;  %p2102_p6 = por %p169_p4, %p168_p3 }
  0x17   : > { %2499 = sst [smem:[#allocation18_spill]] %s2096_s16  ;;  %p1545_p7 = scmp.ge.s32.totalorder %s1986_s1, 1 }
  0x18   : > { %s2501_s18 = scalar_select %p2102_p6, 1, 0 }
  0x19   : > { %p176_p8 = scmp.lt.s32.totalorder %s1986_s1, 3  ;;  %p1623_p9 = scmp.eq.s32.totalorder %s2081_s11, 0 }
  0x1a   : > { %2502 = sst [smem:[#allocation19_spill]] %s2501_s18  ;;  %s1990_s23 = smov [#allocation8]  }
  0x1b   : > { %p2109_p10 = pnand %p1545_p7, %p176_p8  ;;  %s2504_s5 = sld [smem:[#allocation22_spill]] }
  0x1c   : > { %s204_s24 = sshll.u32 %s1990_s23, 4  ;;  %s2506_s4 = sld [smem:[#allocation21_spill]]  ;;  %s205_s24 = int_to_ptr.vmem [resolvable:$true] %s204_s24 }
  0x1d   : > { %p1609_p11 = pneg %p2109_p10  ;;  %s1991_s29 = smov 256  }
  0x1e   : > { %s1992_s30 = smov 16   ;;  %s1993_s8 = smov [#allocation5]  }
  0x1f   : > { %p2120_p12 = pnand %p1623_p9, %p1609_p11  ;;  %s193_s12 = sshll.u32 %s1993_s8, 4  ;;  %s194_s12 = int_to_ptr.vmem [resolvable:$true] %s193_s12 }
  0x20   : > { %s2507_s6 = sld [smem:[#allocation23_spill]]  ;;  %s1994_s21 = smov [#allocation10]  }
  0x21   : > { %s202_s22 = sshll.u32 %s2504_s5, 4  ;;  %s218_s23 = sshll.u32 %s1994_s21, 4  ;;  %s203_s22 = int_to_ptr.hbm [resolvable:$true] %s202_s22  ;;  %s219_s23 = int_to_ptr.vmem [resolvable:$true] %s218_s23 }
  0x22   : > { %s191_s28 = sshll.u32 %s2506_s4, 4  ;;  %s1995_s26 = smov 128   ;;  %s192_s28 = int_to_ptr.hbm [resolvable:$true] %s191_s28 }
  0x23   : > { %1615 = dma.hbm_to_vmem [thread:$0]  (!%p2120_p12), %s203_s22, 2048, %s205_s24, [#allocation9], %s1991_s29, %s1991_s29, %s1992_s30  }
  0x24   : > { %1612 = dma.hbm_to_vmem [thread:$0]  (!%p2120_p12), %s192_s28, 32, %s194_s12, [#allocation6]  }
  0x25   : > { %s1996_s27 = smov 8   ;;  %241 = sbr.rel (%p2109_p10) target bundleno = 4100 (0x1004), region = 40 }
  0x26   : > { %s216_s20 = sshll.u32 %s2507_s6, 4  ;;  %s217_s20 = int_to_ptr.hbm [resolvable:$true] %s216_s20 }
  0x27   : > { %1618 = dma.hbm_to_vmem [thread:$0]  (!%p2120_p12), %s217_s20, 256, %s219_s23, [#allocation9], %s1995_s26, %s1995_s26, %s1996_s27  }
  0x2a   : > { %1961 = dma.done.wait (%p1623_p9), [#allocation6], 32  }
  0x2b   : > { %1963 = vsyncadd (%p1623_p9), [#allocation6], 4294967264 }
  0x2c   : > { %1965 = dma.done.wait (%p1623_p9), [#allocation9], 2304  }
  0x2d   : > { %1967 = vsyncadd (%p1623_p9), [#allocation9], 4294964992  ;;  %p279_p13 = scmp.lt.s32.totalorder %s2081_s11, 1  ;;  %v1997_v0 = vmov 0   ;;  %s2148_s19 = sshll.u32 %s2081_s11, 7  ;;  %v2157_v2 = vld [vmem:[#allocation8 + $0x30] sm:$0xff]  ;;  %v364_v39 = vlaneseq }
  0x2e   : > { %1688 = vset.pattern.permute.xlu0 %v1997_v0  ;;  %s287_s25 = sadd.s32 1, %s2148_s19  ;;  %s2508_s2 = sld [smem:[#allocation20_spill]]  ;;  %394 = vmatpush.msra.mxu0 %v2157_v2  ;;  %v2198_v3 = vld [vmem:[#allocation8 + $0x20] sm:$0xff]  ;;  %v2201_v4 = vld [vmem:[#allocation8 + $0x10] sm:$0xff]  ;;  %vm336_vm0 = vcmask 1040384   ;;  %vm338_vm1 = vcmask 1041408  }
  0x2f   : > { %s280_s22 = scalar_select %p279_p13, %s2081_s11, 1  ;;  %v2203_v5 = vld [vmem:[#allocation8] sm:$0xff]  ;;  %vm340_vm2 = vcmask 1042432   ;;  %vm342_vm3 = vcmask 1043456   ;;  %vm344_vm4 = vcmask 1044480   ;;  %vm346_vm5 = vcmask 1045504  }
  0x30   : > { %s291_s8 = sadd.s32 2, %s2148_s19  ;;  %s295_s12 = sadd.s32 3, %s2148_s19  ;;  %395 = vmatpush.msra.mxu0 %v2198_v3  ;;  %v1694_v6 = vpack.i.bf16 %v2203_v5, %v2201_v4  ;;  %vm348_vm6 = vcmask 1046528   ;;  %v1749_v20 = vld [vmem:[#allocation5] ss:$0 sm:$0xff]  ;;  %vm378_vm7 = vcmask 261120  }
  0x31   : > { %s1555_s24 = sshll.u32 %s280_s22, 3  ;;  %s299_s14 = sadd.s32 4, %s2148_s19  ;;  %v1757_v25 = vld [vmem:[#allocation5 + $0x1] ss:$0 sm:$0xff]  ;;  %v2216_v28 = vld [vmem:[#allocation10] sm:$0xff]  ;;  %vm405_vm8 = vcmask 64512  }
  0x32   : > { %s288_s15 = sld [smem:[#allocation4 + %s287_s25]]  ;;  %s303_s20 = sadd.s32 5, %s2148_s19  ;;  %396 = vmatpush.msra.mxu0 %v2201_v4  ;;  %v377_v29 = vperm.slane %v2216_v28, 0  ;;  %v365_v40 = vand.u32 127, %v364_v39  ;;  %vm683_vm10 = vcmask 130048   ;;  %vm685_vm11 = vcmask 195584  }
  0x33   : > { %s292_s21 = sld [smem:[#allocation4 + %s291_s8]]  ;;  %s307_s23 = sadd.s32 6, %s2148_s19 }
  0x34   : > { %s282_s30 = scalar_lea.vmem %s2508_s2, %s1555_s24  ;;  %s296_s26 = sld [smem:[#allocation4 + %s295_s12]]  ;;  %397 = vmatpush.msra.mxu0 %v2203_v5 }
  0x35   : > { %v350_v1 = vld [vmem:[%s282_s30] sm:$0xff]  ;;  %s311_s27 = sadd.s32 7, %s2148_s19  ;;  %s2164_s22 = sld [smem:[#allocation4 + %s299_s14]] }
  0x36   : > { %354 = vperm.xlu0 %1688, %v350_v1   ;;  %s2166_s24 = sld [smem:[#allocation4 + %s303_s20]]  ;;  %s1998_s10 = smov 80  }
  0x37   : > { %s2168_s28 = sld [smem:[#allocation4 + %s307_s23]]  ;;  %s1999_s13 = smov 88  }
  0x38   : > { %s289_s25 = scalar_lea.vmem %s2483_s3, %s288_s15  ;;  %s2173_s2 = sld [smem:[#allocation4 + %s311_s27]] }
  0x39   : > { %s293_s12 = scalar_lea.vmem %s2483_s3, %s292_s21  ;;  %s284_s8 = sld [smem:[#allocation4 + %s2148_s19]]  ;;  %v1750_v7 = vld [vmem:[%s289_s25] ss:$0 sm:$0xff] }
  0x3a   : > { %s297_s20 = scalar_lea.vmem %s2483_s3, %s296_s26  ;;  %v1751_v9 = vld [vmem:[%s293_s12] ss:$0 sm:$0xff]  ;;  %s2000_s16 = smov 96  }
  0x3b   : > { %s301_s23 = scalar_lea.vmem %s2483_s3, %s2164_s22  ;;  %v1752_v11 = vld [vmem:[%s297_s20] ss:$0 sm:$0xff]  ;;  %s2001_s18 = smov 72  }
  0x3c   : > { %s305_s29 = scalar_lea.vmem %s2483_s3, %s2166_s24  ;;  %v1753_v13 = vld [vmem:[%s301_s23] ss:$0 sm:$0xff]  ;;  %s2002_s19 = smov 120  }
  0x3d   : > { %s309_s30 = scalar_lea.vmem %s2483_s3, %s2168_s28  ;;  %v1754_v15 = vld [vmem:[%s305_s29] ss:$0 sm:$0xff]  ;;  %s2003_s26 = smov 112  }
  0x3e   : > { %s313_s21 = scalar_lea.vmem %s2483_s3, %s2173_s2  ;;  %v1755_v17 = vld [vmem:[%s309_s30] ss:$0 sm:$0xff]  ;;  %s2004_s22 = smov 104  }
  0x3f   : > { %s285_s2 = scalar_lea.vmem %s2483_s3, %s284_s8  ;;  %v1756_v19 = vld [vmem:[%s313_s21] ss:$0 sm:$0xff]  ;;  %s363_s24 = sld [smem:[#allocation3 + %s2081_s11]] }
  0x40   : > { %v286_v8 = vld [vmem:[%s285_s2] sm:$0x1]  ;;  %s2005_s28 = smov 64   ;;  %s2006_s25 = smov 40  }
  0x41   : > { %v337_v10 = vsel %vm336_vm0, %v286_v8, %v1750_v7  ;;  %s2007_s12 = smov 56   ;;  %s2008_s14 = smov 48  }
  0x42   : > { %v339_v12 = vsel %vm338_vm1, %v337_v10, %v1751_v9  ;;  %s2009_s20 = smov 32   ;;  %s2010_s23 = smov 8  }
  0x43   : > { %v341_v14 = vsel %vm340_vm2, %v339_v12, %v1752_v11  ;;  %s2011_s29 = smov 24   ;;  %s2012_s15 = smov 16  }
  0x44   : > { %v343_v16 = vsel %vm342_vm3, %v341_v14, %v1753_v13  ;;  %s276_s27 = sand.u32 1, %s1978_s0   ;;  %s1592_s4 = sshll.u32 %s2081_s11, 3 }
  0x45   : > { %v345_v18 = vsel %vm344_vm4, %v343_v16, %v1754_v15  ;;  %v366_v41 = vstv %s363_s24  ;;  %s1554_s30 = sshll.u32 %s276_s27, 3  ;;  %s1441_s5 = scalar_lea.hbm %s2487_s7, %s1592_s4 }
  0x46   : > { %v347_v21 = vsel %vm346_vm5, %v345_v18, %v1755_v17  ;;  %vm2247_vm9 = vcmp.lt.s32.totalorder %v365_v40, %v366_v41  ;;  %s278_s6 = scalar_lea.vmem [#allocation11], %s1554_s30  ;;  %s1431_s11 = scalar_lea.sflag [#allocation7], %s276_s27 }
  0x47   : > { %v349_v23 = vsel %vm348_vm6, %v347_v21, %v1756_v19  ;;  %s1443_s2 = sshll.u32 %s278_s6, 4  ;;  %s1444_s2 = int_to_ptr.vmem [resolvable:$true] %s1443_s2 }
  0xa8   : > { %v355_v22 = vpop.permute.xlu0 %354 }
  0xa9   : > { %v358_v24 = vmul.f32 %v1749_v20, %v355_v22 }
  0xab   : > { %v359_v26 = vadd.f32 %v358_v24, %v349_v23 }
  0xad   : > { %v2212_v27 = vadd.f32 %v1757_v25, %v359_v26 }
  0xaf   : > { %1557 = vmatmul.msk.f32.vlgmr.msra.gmra.mxu0 %vm378_vm7, %v2212_v27 }
 0x12c   : > { %v399_v30 = vpop.f32.mrf.mxu0 }
 0x12d   : > { %v2221_v31 = vadd.f32 %v399_v30, %v377_v29 }
 0x12f   : > { %538 = vrot.lane.b32.xlu2 %v2221_v31, %s1998_s10  ;;  %471 = vrot.lane.b32.xlu1 %v2221_v31, %s1999_s13 }
 0x130   : > { %403 = vrot.lane.b32.xlu0 %v2221_v31, %s2000_s16 }
 0x137   : > { %605 = vrot.lane.b32.xlu2 %v2221_v31, %s2001_s18  ;;  %469 = vrot.lane.b32.xlu1 %v2221_v31, %s2002_s19 }
 0x138   : > { %536 = vrot.lane.b32.xlu0 %v2221_v31, %s2003_s26 }
 0x13f   : > { %603 = vrot.lane.b32.xlu1 %v2221_v31, %s2004_s22 }
 0x189   : > { %v539_v32 = vpop.permute.xlu2 %538 }
 0x191   : > { %v606_v33 = vpop.permute.xlu2 %605 }
 0x192   : > { %1567 = vmatpush.xpose.msk.msrb.mxu0 %vm405_vm8, %v606_v33 }
 0x1a1   : > { %v472_v34 = vpop.permute.xlu1 %471 }
 0x1a2   : > { %v404_v35 = vpop.permute.xlu0 %403  ;;  %1561 = vmatpush.xpose.msk.msra.mxu3 %vm405_vm8, %v472_v34 }
 0x1a3   : > { %1558 = vmatpush.xpose.msk.msra.mxu1 %vm405_vm8, %v404_v35 }
 0x1a6   : > { %1559 = vmatmul.msk.f32.vlgmr.msra.gmra.mxu1 %vm405_vm8, %v2221_v31 }
 0x1a7   : > { %1564 = vmatpush.xpose.msk.msrb.mxu1 %vm405_vm8, %v539_v32 }
 0x1a9   : > { %v470_v36 = vpop.permute.xlu1 %469 }
 0x1aa   : > { %1562 = vmatmul.msk.f32.vlgmr.msra.gmra.mxu3 %vm405_vm8, %v470_v36  ;;  %v537_v37 = vpop.permute.xlu0 %536 }
 0x1ae   : > { %1565 = vmatmul.msk.f32.vlgmr.msrb.gmra.mxu1 %vm405_vm8, %v537_v37 }
 0x1b1   : > { %v604_v38 = vpop.permute.xlu1 %603 }
 0x1b2   : > { %1568 = vmatmul.msk.f32.vlgmr.msrb.gmra.mxu0 %vm405_vm8, %v604_v38 }
 0x223   : > { %v427_v42 = vpop.f32.mrf.mxu1 }
 0x224   : > { %v430_v44 = vmul.f32 0.35355338, %v427_v42 }
 0x226   : > { %v431_v45 = vsel %vm2247_vm9, %v430_v44, -1000000.0 }
 0x227   : > { %v432_v46 = vsel %vm405_vm8, %v431_v45, -inf }
 0x228   : > { %433 = vmax.xlane.f32.xlu2 %v432_v46 }
 0x22b   : > { %v561_v47 = vpop.f32.mrf.mxu1 }
 0x22c   : > { %v564_v48 = vmul.f32 0.35355338, %v561_v47 }
 0x22d   : > { %v494_v49 = vpop.f32.mrf.mxu3 }
 0x22e   : > { %v497_v50 = vmul.f32 0.35355338, %v494_v49  ;;  %v565_v51 = vsel %vm2247_vm9, %v564_v48, -1000000.0 }
 0x22f   : > { %v628_v52 = vpop.f32.mrf.mxu0  ;;  %v566_v53 = vsel %vm405_vm8, %v565_v51, -inf }
 0x230   : > { %v631_v54 = vmul.f32 0.35355338, %v628_v52  ;;  %567 = vmax.xlane.f32.xlu1 %v566_v53  ;;  %v498_v55 = vsel %vm2247_vm9, %v497_v50, -1000000.0 }
 0x231   : > { %v499_v56 = vsel %vm405_vm8, %v498_v55, -inf }
 0x232   : > { %500 = vmax.xlane.f32.xlu0 %v499_v56  ;;  %v632_v57 = vsel %vm2247_vm9, %v631_v54, -1000000.0 }
 0x233   : > { %v633_v58 = vsel %vm405_vm8, %v632_v57, -inf }
 0x234   : > { %634 = vmax.xlane.f32.xlu2 %v633_v58 }
 0x249   : > { %443 = vrot.lane.b32.xlu1 %v2221_v31, %s2005_s28 }
 0x251   : > { %644 = vrot.lane.b32.xlu1 %v2221_v31, %s2006_s25 }
 0x29b   : > { %v434_v59 = vpop.xlane.xlu2 %433 }
 0x29c   : > { %v435_v60 = vsub.f32 %v431_v45, %v434_v59 }
 0x29e   : > { %v436_v61 = vmul.f32 1.442695, %v435_v60 }
 0x2a0   : > { %1758 = vpow2.f32 %v436_v61 }
 0x2a3   : > { %v568_v62 = vpop.xlane.xlu1 %567 }
 0x2a4   : > { %v569_v63 = vsub.f32 %v565_v51, %v568_v62 }
 0x2a5   : > { %v501_v7 = vpop.xlane.xlu0 %500 }
 0x2a6   : > { %v1759_v0 = vpop.eup %1758  ;;  %v570_v1 = vmul.f32 1.442695, %v569_v63  ;;  %v502_v11 = vsub.f32 %v498_v55, %v501_v7 }
 0x2a7   : > { %v438_v8 = vsel %vm405_vm8, %v1759_v0, 0.0  ;;  %v635_v9 = vpop.xlane.xlu2 %634 }
 0x2a8   : > { %1760 = vpow2.f32 %v570_v1  ;;  %439 = vadd.xlane.f32.xlu2 %v438_v8  ;;  %v636_v10 = vsub.f32 %v632_v57, %v635_v9  ;;  %v503_v14 = vmul.f32 1.442695, %v502_v11  ;;  %v2013_v57 = vmov 32.0   ;;  %v375_v9 = vld [vmem:[#allocation8 + $0x38] sm:$0xff] }
 0x2a9   : > { %v371_v11 = vld [vmem:[#allocation8 + $0x18] sm:$0xff] }
 0x2aa   : > { %v637_v12 = vmul.f32 1.442695, %v636_v10  ;;  %v373_v10 = vld [vmem:[#allocation8 + $0x28] sm:$0xff] }
 0x2ac   : > { %1762 = vpow2.f32 %v637_v12  ;;  %v369_v12 = vld [vmem:[#allocation8 + $0x8] sm:$0xff] }
 0x2ad   : > { %1764 = vpow2.f32 %v503_v14 }
 0x2ae   : > { %v1761_v13 = vpop.eup %1760 }
 0x2af   : > { %v572_v15 = vsel %vm405_vm8, %v1761_v13, 0.0 }
 0x2b0   : > { %573 = vadd.xlane.f32.xlu2 %v572_v15 }
 0x2b2   : > { %v1763_v16 = vpop.eup %1762 }
 0x2b3   : > { %v639_v17 = vsel %vm405_vm8, %v1763_v16, 0.0  ;;  %v1765_v18 = vpop.eup %1764 }
 0x2b4   : > { %640 = vadd.xlane.f32.xlu0 %v639_v17  ;;  %v505_v20 = vsel %vm405_vm8, %v1765_v18, 0.0  ;;  %v1704_v17 = vpack.i.bf16 %v369_v12, %v371_v11 }
 0x2bb   : > { %v444_v19 = vpop.permute.xlu1 %443 }
 0x2bc   : > { %464 = vmatpush.msra.mxu2 %v444_v19  ;;  %506 = vadd.xlane.f32.xlu0 %v505_v20 }
 0x2c3   : > { %v645_v30 = vpop.permute.xlu1 %644 }
 0x2c8   : > { %510 = vrot.lane.b32.xlu2 %v2221_v31, %s2007_s12 }
 0x2d0   : > { %577 = vrot.lane.b32.xlu0 %v2221_v31, %s2008_s14  ;;  %v1689_v31 = vpack.i.bf16 %v2198_v3, %v2157_v2  ;;  %1695 = vrot.lane.b32.xlu2 %v1694_v6, %s2009_s20  ;;  %v2290_v2 = vperm.slane %v2216_v28, 2 }
 0x2d2   : > { %1690 = vrot.lane.b32.xlu1 %v1689_v31, %s2009_s20 }
 0x2d8   : > { %704 = vrot.lane.b32.xlu2 %v377_v29, %s2009_s20 }
 0x2e0   : > { %763 = vrot.lane.b32.xlu2 %v2290_v2, %s2000_s16 }
 0x31b   : > { %v440_v21 = vpop.xlane.xlu2 %439 }
 0x31c   : > { %1766 = vrcp.f32 %v440_v21 }
 0x322   : > { %v1767_v22 = vpop.eup %1766 }
 0x323   : > { %v574_v23 = vpop.xlane.xlu2 %573  ;;  %v442_v24 = vmul.f32 %v1767_v22, %v1759_v0 }
 0x325   : > { %1560 = vmatmul.msk.f32.vlgmr.msra.gmra.mxu2 %vm405_vm8, %v442_v24 }
 0x327   : > { %v641_v25 = vpop.xlane.xlu0 %640 }
 0x32b   : > { %v511_v26 = vpop.permute.xlu2 %510 }
 0x32c   : > { %531 = vmatpush.msrb.mxu2 %v511_v26 }
 0x32e   : > { %665 = vmatpush.msra.mxu2 %v645_v30 }
 0x32f   : > { %v507_v32 = vpop.xlane.xlu0 %506 }
 0x330   : > { %1768 = vrcp.f32 %v507_v32 }
 0x331   : > { %1770 = vrcp.f32 %v641_v25 }
 0x332   : > { %1772 = vrcp.f32 %v574_v23 }
 0x333   : > { %v1696_v40 = vpop.permute.xlu2 %1695  ;;  %1774 = vrcp.f32 %v2013_v57 }
 0x334   : > { %v1697_v44 = vunpack.i.l.bf16 %v1696_v40  ;;  %v1698_v45 = vunpack.i.h.bf16 %v1696_v40 }
 0x336   : > { %v1769_v33 = vpop.eup %1768 }
 0x337   : > { %v509_v34 = vmul.f32 %v1769_v33, %v1765_v18  ;;  %v1771_v35 = vpop.eup %1770  ;;  %v767_v33 = vperm.slane %v2216_v28, 1 }
 0x338   : > { %v1773_v36 = vpop.eup %1772  ;;  %v643_v37 = vmul.f32 %v1771_v35, %v1763_v16 }
 0x339   : > { %1563 = vmatmul.msk.f32.vlgmr.msrb.gmra.mxu2 %vm405_vm8, %v509_v34  ;;  %v576_v39 = vmul.f32 %v1773_v36, %v1761_v13  ;;  %v1775_v58 = vpop.eup %1774  ;;  %v1699_v13 = vpack.i.bf16 %v373_v10, %v375_v9 }
 0x33a   : > { %v735_v59 = vmul.f32 32.0, %v1775_v58  ;;  %vm739_vm12 = vweird.f32 %v1775_v58 }
 0x33b   : > { %v705_v52 = vpop.permute.xlu2 %704  ;;  %1700 = vrot.lane.b32.xlu2 %v1699_v13, %s2005_s28 }
 0x33c   : > { %v736_v60 = vsub.f32 1.0, %v735_v59  ;;  %v2337_v59 = vld [vmem:[#allocation8 + $0x40] sm:$0xff] }
 0x33e   : > { %v737_v61 = vmul.f32 %v1775_v58, %v736_v60 }
 0x340   : > { %v738_v62 = vadd.f32 %v1775_v58, %v737_v61 }
 0x341   : > { %1569 = vmatmul.msk.f32.vlgmr.msra.gmra.mxu2 %vm405_vm8, %v643_v37 }
 0x342   : > { %v578_v38 = vpop.permute.xlu0 %577  ;;  %v2303_v63 = vsel %vm739_vm12, %v1775_v58, %v738_v62  ;;  %v2334_v58 = vld [vmem:[#allocation8 + $0x50] sm:$0xff] }
 0x343   : > { %598 = vmatpush.msrb.mxu3 %v578_v38  ;;  %1705 = vrot.lane.b32.xlu2 %v1704_v17, %s2005_s28  ;;  %v764_v26 = vpop.permute.xlu2 %763  ;;  %v1724_v60 = vpack.i.bf16 %v2337_v59, %v2334_v58 }
 0x344   : > { %1566 = vmatmul.msk.f32.vlgmr.msrb.gmra.mxu3 %vm405_vm8, %v576_v39  ;;  %v1691_v29 = vpop.permute.xlu1 %1690 }
 0x345   : > { %v1693_v41 = vunpack.i.h.bf16 %v1691_v29  ;;  %v1692_v42 = vunpack.i.l.bf16 %v1691_v29  ;;  %783 = vmatpush.msra.mxu3 %v375_v9 }
 0x347   : > { %722 = vmatpush.msra.mxu1 %v1692_v42  ;;  %784 = vmatpush.msra.mxu3 %v373_v10 }
 0x349   : > { %723 = vmatpush.msra.mxu1 %v1693_v41  ;;  %785 = vmatpush.msra.mxu3 %v371_v11 }
 0x34b   : > { %724 = vmatpush.msra.mxu1 %v1697_v44  ;;  %786 = vmatpush.msra.mxu3 %v369_v12 }
 0x34c   : > { %1710 = vrot.lane.b32.xlu2 %v1699_v13, %s2009_s20 }
 0x34d   : > { %725 = vmatpush.msra.mxu1 %v1698_v45 }
 0x354   : > { %1715 = vrot.lane.b32.xlu2 %v1704_v17, %s2009_s20  ;;  %v2347_v17 = vld [vmem:[#allocation10 + $0x8] sm:$0xff] }
 0x355   : > { %v2401_v43 = vperm.slane %v2347_v17, 2 }
 0x395   : > { %v1701_v34 = vpop.permute.xlu2 %1700 }
 0x396   : > { %v1703_v31 = vunpack.i.h.bf16 %v1701_v34  ;;  %v1702_v35 = vunpack.i.l.bf16 %v1701_v34 }
 0x398   : > { %859 = vmatpush.msrb.mxu2 %v1702_v35 }
 0x39a   : > { %860 = vmatpush.msrb.mxu2 %v1703_v31 }
 0x39d   : > { %v1706_v36 = vpop.permute.xlu2 %1705 }
 0x39e   : > { %v1708_v37 = vunpack.i.h.bf16 %v1706_v36  ;;  %v1707_v38 = vunpack.i.l.bf16 %v1706_v36 }
 0x3a0   : > { %861 = vmatpush.msrb.mxu2 %v1707_v38 }
 0x3a2   : > { %862 = vmatpush.msrb.mxu2 %v1708_v37 }
 0x3a6   : > { %v1711_v28 = vpop.permute.xlu2 %1710 }
 0x3a8   : > { %v466_v3 = vpop.f32.mrf.mxu2 }
 0x3ae   : > { %v1716_v29 = vpop.permute.xlu2 %1715 }
 0x3af   : > { %v1718_v40 = vunpack.i.h.bf16 %v1716_v29  ;;  %v1717_v41 = vunpack.i.l.bf16 %v1716_v29 }
 0x3bc   : > { %v533_v4 = vpop.f32.mrf.mxu2 }
 0x3bd   : > { %671 = vrot.lane.b32.xlu0 %v533_v4, %s2010_s23 }
 0x3c4   : > { %v667_v5 = vpop.f32.mrf.mxu2 }
 0x3c5   : > { %679 = vrot.lane.b32.xlu0 %v667_v5, %s2011_s29  ;;  %v1713_v5 = vunpack.i.h.bf16 %v1711_v28 }
 0x3c7   : > { %v600_v6 = vpop.f32.mrf.mxu3 }
 0x3c8   : > { %675 = vrot.lane.b32.xlu1 %v600_v6, %s2012_s15  ;;  %v1712_v6 = vunpack.i.l.bf16 %v1711_v28 }
 0x3ca   : > { %825 = vmatpush.msra.mxu0 %v1712_v6 }
 0x3cc   : > { %826 = vmatpush.msra.mxu0 %v1713_v5 }
 0x3ce   : > { %827 = vmatpush.msra.mxu0 %v1717_v41 }
 0x3d0   : > { %828 = vmatpush.msra.mxu0 %v1718_v40 }
 0x42f   : > { %v672_v46 = vpop.permute.xlu0 %671 }
 0x430   : > { %v682_v47 = vsel %vm405_vm8, %v466_v3, %v672_v46 }
 0x437   : > { %v680_v49 = vpop.permute.xlu0 %679 }
 0x43a   : > { %v676_v48 = vpop.permute.xlu1 %675 }
 0x43b   : > { %v684_v50 = vsel %vm683_vm10, %v682_v47, %v676_v48 }
 0x43c   : > { %v686_v51 = vsel %vm685_vm11, %v684_v50, %v680_v49 }
 0x43d   : > { %1570 = vmatmul.msk.f32.vlgmr.msra.gmra.mxu1 %vm378_vm7, %v686_v51 }
 0x4ba   : > { %v727_v53 = vpop.f32.mrf.mxu1 }
 0x4bb   : > { %v728_v54 = vadd.f32 %v727_v53, %v705_v52 }
 0x4bd   : > { %v730_v55 = vadd.f32 %v728_v54, %v2212_v27 }
 0x4bf   : > { %v731_v56 = vsel %vm378_vm7, %v730_v55, 0.0 }
 0x4c0   : > { %732 = vadd.xlane.f32.xlu1 %v731_v56  ;;  %v2329_v56 = vld [vmem:[#allocation8 + $0x60] sm:$0xff] }
 0x533   : > { %v733_v0 = vpop.xlane.xlu1 %732 }
 0x534   : > { %v741_v1 = vmul.f32 %v2303_v63, %v733_v0 }
 0x536   : > { %v742_v7 = vsub.f32 %v730_v55, %v741_v1  ;;  %v2326_v55 = vld [vmem:[#allocation8 + $0x70] sm:$0xff] }
 0x537   : > { %930 = vmatpush.msrb.mxu1 %v2326_v55  ;;  %v1719_v57 = vpack.i.bf16 %v2329_v56, %v2326_v55 }
 0x538   : > { %v743_v8 = vmul.f32 %v742_v7, %v742_v7 }
 0x539   : > { %931 = vmatpush.msrb.mxu1 %v2329_v56 }
 0x53a   : > { %v744_v27 = vsel %vm378_vm7, %v743_v8, 0.0 }
 0x53b   : > { %745 = vadd.xlane.f32.xlu0 %v744_v27  ;;  %932 = vmatpush.msrb.mxu1 %v2334_v58 }
 0x53d   : > { %933 = vmatpush.msrb.mxu1 %v2337_v59 }
 0x54f   : > { %868 = vrot.lane.b32.xlu0 %v767_v33, %s2005_s28 }
 0x5ae   : > { %v746_v14 = vpop.xlane.xlu0 %745 }
 0x5af   : > { %v747_v15 = vmul.f32 %v746_v14, %v2303_v63 }
 0x5b1   : > { %v748_v16 = vadd.f32 1e-05, %v747_v15 }
 0x5b3   : > { %1776 = vrsqrt.f32 %v748_v16  ;;  %vm755_vm14 = vweird.f32 %v748_v16 }
 0x5b9   : > { %v1777_v18 = vpop.eup %1776 }
 0x5ba   : > { %v750_v19 = vmul.f32 %v1777_v18, %v748_v16  ;;  %vm756_vm13 = vweird.f32 %v1777_v18 }
 0x5bb   : > { %vm757_vm15 = vmor %vm755_vm14, %vm756_vm13 }
 0x5bc   : > { %v751_v20 = vmul.f32 %v1777_v18, %v750_v19 }
 0x5be   : > { %v752_v21 = vmul.f32 0.5, %v751_v20 }
 0x5c0   : > { %v753_v22 = vsub.f32 1.5, %v752_v21 }
 0x5c1   : > { %v869_v46 = vpop.permute.xlu0 %868 }
 0x5c2   : > { %v754_v23 = vmul.f32 %v1777_v18, %v753_v22 }
 0x5c4   : > { %v758_v24 = vsel %vm757_vm15, %v1777_v18, %v754_v23  ;;  %v914_v18 = vperm.slane %v2347_v17, 0 }
 0x5c5   : > { %v759_v25 = vmul.f32 %v758_v24, %v742_v7 }
 0x5c7   : > { %v761_v30 = vmul.f32 %v2290_v2, %v759_v25 }
 0x5c9   : > { %v766_v32 = vadd.f32 %v764_v26, %v761_v30 }
 0x5cb   : > { %1571 = vmatmul.msk.f32.vlgmr.msra.gmra.mxu3 %vm378_vm7, %v766_v32 }
 0x64e   : > { %v788_v39 = vpop.f32.mrf.mxu3 }
 0x64f   : > { %v789_v3 = vadd.f32 %v788_v39, %v767_v33 }
 0x651   : > { %v791_v4 = vmax.f32 %v789_v3, 0.0 }
 0x653   : > { %793 = vrot.lane.b32.xlu1 %v791_v4, %s2000_s16  ;;  %1573 = vmatmul.msk.f32.vlgmr.msrb.gmra.mxu2 %vm378_vm7, %v791_v4 }
 0x65b   : > { %895 = vrot.lane.b32.xlu1 %v2290_v2, %s2005_s28 }
 0x663   : > { %899 = vrot.lane.b32.xlu1 %v2290_v2, %s2009_s20 }
 0x6c5   : > { %v794_v42 = vpop.permute.xlu1 %793 }
 0x6c6   : > { %1572 = vmatmul.msk.f32.vlgmr.msra.gmra.mxu0 %vm378_vm7, %v794_v42 }
 0x6cd   : > { %v896_v27 = vpop.permute.xlu1 %895 }
 0x6d5   : > { %v900_v14 = vpop.permute.xlu1 %899 }
 0x6d6   : > { %v864_v44 = vpop.f32.mrf.mxu2 }
 0x743   : > { %v830_v45 = vpop.f32.mrf.mxu0 }
 0x744   : > { %v865_v47 = vadd.f32 %v864_v44, %v830_v45 }
 0x746   : > { %v871_v48 = vadd.f32 %v869_v46, %v865_v47 }
 0x748   : > { %v872_v49 = vadd.f32 %v871_v48, %v766_v32 }
 0x74a   : > { %v873_v2 = vsel %vm378_vm7, %v872_v49, 0.0 }
 0x74b   : > { %874 = vadd.xlane.f32.xlu2 %v873_v2 }
 0x7be   : > { %v875_v50 = vpop.xlane.xlu2 %874 }
 0x7bf   : > { %v876_v51 = vmul.f32 %v875_v50, %v2303_v63 }
 0x7c1   : > { %v877_v52 = vsub.f32 %v872_v49, %v876_v51 }
 0x7c3   : > { %v878_v53 = vmul.f32 %v877_v52, %v877_v52 }
 0x7c5   : > { %v879_v54 = vsel %vm378_vm7, %v878_v53, 0.0 }
 0x7c6   : > { %880 = vadd.xlane.f32.xlu0 %v879_v54 }
 0x839   : > { %v881_v61 = vpop.xlane.xlu0 %880 }
 0x83a   : > { %v882_v62 = vmul.f32 %v881_v61, %v2303_v63 }
 0x83c   : > { %v883_v0 = vadd.f32 1e-05, %v882_v62 }
 0x83e   : > { %1778 = vrsqrt.f32 %v883_v0  ;;  %vm890_vm1 = vweird.f32 %v883_v0 }
 0x844   : > { %v1779_v1 = vpop.eup %1778 }
 0x845   : > { %v885_v7 = vmul.f32 %v1779_v1, %v883_v0  ;;  %vm891_vm0 = vweird.f32 %v1779_v1 }
 0x846   : > { %vm892_vm2 = vmor %vm890_vm1, %vm891_vm0 }
 0x847   : > { %v886_v8 = vmul.f32 %v1779_v1, %v885_v7 }
 0x849   : > { %v887_v9 = vmul.f32 0.5, %v886_v8 }
 0x84b   : > { %v888_v10 = vsub.f32 1.5, %v887_v9 }
 0x84d   : > { %v889_v11 = vmul.f32 %v1779_v1, %v888_v10 }
 0x84f   : > { %v893_v12 = vsel %vm892_vm2, %v1779_v1, %v889_v11 }
 0x850   : > { %v894_v13 = vmul.f32 %v893_v12, %v877_v52 }
 0x852   : > { %v898_v15 = vmul.f32 %v896_v27, %v894_v13 }
 0x854   : > { %v2343_v16 = vadd.f32 %v900_v14, %v898_v15 }
 0x856   : > { %1574 = vmatmul.msk.f32.vlgmr.msrb.gmra.mxu1 %vm378_vm7, %v2343_v16 }
 0x8d3   : > { %v935_v19 = vpop.f32.mrf.mxu1 }
 0x8d4   : > { %v2350_v20 = vadd.f32 %v935_v19, %v914_v18 }
 0x8d6   : > { %1140 = vrot.lane.b32.xlu0 %v2350_v20, %s2001_s18  ;;  %1006 = vrot.lane.b32.xlu2 %v2350_v20, %s1999_s13 }
 0x8d7   : > { %939 = vrot.lane.b32.xlu1 %v2350_v20, %s2000_s16 }
 0x8de   : > { %1138 = vrot.lane.b32.xlu2 %v2350_v20, %s2004_s22 }
 0x8df   : > { %1004 = vrot.lane.b32.xlu1 %v2350_v20, %s2002_s19 }
 0x8e7   : > { %1073 = vrot.lane.b32.xlu1 %v2350_v20, %s1998_s10  ;;  %s1445_s10 = sshll.u32 %s1441_s5, 4  ;;  %s1446_s10 = int_to_ptr.hbm [resolvable:$true] %s1445_s10 }
 0x8e8   : > { %s1928_s13 = sshra.s32 %s1446_s10, 4  ;;  %s1929_s13 = int_to_ptr.hbm [resolvable:$true] %s1928_s13 }
 0x8e9   : > { %p1935_p3 = scmp.lt.s32.totalorder %s1929_s13, %s2487_s7 }
 0x8ef   : > { %1071 = vrot.lane.b32.xlu1 %v2350_v20, %s2003_s26  ;;  %s1934_s26 = scalar_lea.hbm %s2487_s7, 16 }
 0x930   : > { %v1007_v21 = vpop.permute.xlu2 %1006 }
 0x931   : > { %1578 = vmatpush.xpose.msk.msra.mxu2 %vm405_vm8, %v1007_v21 }
 0x938   : > { %v1139_v25 = vpop.permute.xlu2 %1138 }
 0x948   : > { %v1141_v22 = vpop.permute.xlu0 %1140 }
 0x949   : > { %v940_v23 = vpop.permute.xlu1 %939  ;;  %1584 = vmatpush.xpose.msk.msrb.mxu2 %vm405_vm8, %v1141_v22 }
 0x94a   : > { %1575 = vmatpush.xpose.msk.msrb.mxu3 %vm405_vm8, %v940_v23 }
 0x94d   : > { %1576 = vmatmul.msk.f32.vlgmr.msrb.gmra.mxu3 %vm405_vm8, %v2350_v20 }
 0x951   : > { %v1005_v24 = vpop.permute.xlu1 %1004 }
 0x952   : > { %1579 = vmatmul.msk.f32.vlgmr.msra.gmra.mxu2 %vm405_vm8, %v1005_v24 }
 0x959   : > { %v1074_v26 = vpop.permute.xlu1 %1073 }
 0x95a   : > { %1581 = vmatpush.xpose.msk.msra.mxu3 %vm405_vm8, %v1074_v26  ;;  %1585 = vmatmul.msk.f32.vlgmr.msrb.gmra.mxu2 %vm405_vm8, %v1139_v25 }
 0x961   : > { %v1072_v30 = vpop.permute.xlu1 %1071 }
 0x962   : > { %1582 = vmatmul.msk.f32.vlgmr.msra.gmra.mxu3 %vm405_vm8, %v1072_v30 }
 0x9d0   : > { %v962_v32 = vpop.f32.mrf.mxu3 }
 0x9d1   : > { %v965_v33 = vmul.f32 0.35355338, %v962_v32 }
 0x9d3   : > { %v966_v34 = vsel %vm2247_vm9, %v965_v33, -1000000.0 }
 0x9d4   : > { %v967_v31 = vsel %vm405_vm8, %v966_v34, -inf }
 0x9d5   : > { %968 = vmax.xlane.f32.xlu1 %v967_v31  ;;  %v1029_v35 = vpop.f32.mrf.mxu2 }
 0x9d6   : > { %v1032_v36 = vmul.f32 0.35355338, %v1029_v35 }
 0x9d8   : > { %v1033_v37 = vsel %vm2247_vm9, %v1032_v36, -1000000.0 }
 0x9d9   : > { %v1034_v38 = vsel %vm405_vm8, %v1033_v37, -inf }
 0x9da   : > { %1035 = vmax.xlane.f32.xlu2 %v1034_v38 }
 0x9dd   : > { %v1163_v39 = vpop.f32.mrf.mxu2 }
 0x9de   : > { %v1166_v3 = vmul.f32 0.35355338, %v1163_v39 }
 0x9e0   : > { %v1167_v4 = vsel %vm2247_vm9, %v1166_v3, -1000000.0 }
 0x9e1   : > { %v1168_v28 = vsel %vm405_vm8, %v1167_v4, -inf }
 0x9e2   : > { %1169 = vmax.xlane.f32.xlu1 %v1168_v28 }
 0x9e5   : > { %v1096_v5 = vpop.f32.mrf.mxu3 }
 0x9e6   : > { %v1099_v6 = vmul.f32 0.35355338, %v1096_v5 }
 0x9e8   : > { %v1100_v29 = vsel %vm2247_vm9, %v1099_v6, -1000000.0 }
 0x9e9   : > { %v1101_v40 = vsel %vm405_vm8, %v1100_v29, -inf }
 0x9ea   : > { %1102 = vmax.xlane.f32.xlu0 %v1101_v40 }
 0x9fe   : > { %978 = vrot.lane.b32.xlu0 %v2350_v20, %s2005_s28 }
 0xa06   : > { %1179 = vrot.lane.b32.xlu0 %v2350_v20, %s2006_s25 }
 0xa0e   : > { %1720 = vrot.lane.b32.xlu0 %v1719_v57, %s2009_s20 }
 0xa16   : > { %1725 = vrot.lane.b32.xlu0 %v1724_v60, %s2009_s20 }
 0xa1e   : > { %1237 = vrot.lane.b32.xlu0 %v914_v18, %s2009_s20 }
 0xa26   : > { %1289 = vrot.lane.b32.xlu0 %v2401_v43, %s2000_s16 }
 0xa48   : > { %v969_v41 = vpop.xlane.xlu1 %968 }
 0xa49   : > { %v970_v42 = vsub.f32 %v966_v34, %v969_v41 }
 0xa4b   : > { %v971_v44 = vmul.f32 1.442695, %v970_v42 }
 0xa4d   : > { %1780 = vpow2.f32 %v971_v44  ;;  %v1036_v45 = vpop.xlane.xlu2 %1035  ;;  %v909_v44 = vld [vmem:[#allocation8 + $0x68] sm:$0xff] }
 0xa4e   : > { %v1037_v46 = vsub.f32 %v1033_v37, %v1036_v45  ;;  %v911_v45 = vld [vmem:[#allocation8 + $0x78] sm:$0xff] }
 0xa50   : > { %v1038_v47 = vmul.f32 1.442695, %v1037_v46  ;;  %v1729_v46 = vpack.i.bf16 %v909_v44, %v911_v45 }
 0xa52   : > { %1782 = vpow2.f32 %v1038_v47  ;;  %1730 = vrot.lane.b32.xlu0 %v1729_v46, %s2009_s20  ;;  %v907_v47 = vld [vmem:[#allocation8 + $0x58] sm:$0xff] }
 0xa53   : > { %v1781_v48 = vpop.eup %1780 }
 0xa54   : > { %v973_v49 = vsel %vm405_vm8, %v1781_v48, 0.0 }
 0xa55   : > { %974 = vadd.xlane.f32.xlu2 %v973_v49  ;;  %v1170_v2 = vpop.xlane.xlu1 %1169 }
 0xa56   : > { %v1171_v50 = vsub.f32 %v1167_v4, %v1170_v2 }
 0xa58   : > { %v1783_v51 = vpop.eup %1782  ;;  %v1172_v52 = vmul.f32 1.442695, %v1171_v50 }
 0xa59   : > { %v1040_v53 = vsel %vm405_vm8, %v1783_v51, 0.0 }
 0xa5a   : > { %1784 = vpow2.f32 %v1172_v52  ;;  %1041 = vadd.xlane.f32.xlu1 %v1040_v53 }
 0xa5d   : > { %v1103_v54 = vpop.xlane.xlu0 %1102 }
 0xa5e   : > { %v1104_v55 = vsub.f32 %v1100_v29, %v1103_v54 }
 0xa60   : > { %v1785_v56 = vpop.eup %1784  ;;  %v1105_v57 = vmul.f32 1.442695, %v1104_v55 }
 0xa61   : > { %v1174_v58 = vsel %vm405_vm8, %v1785_v56, 0.0 }
 0xa62   : > { %1786 = vpow2.f32 %v1105_v57  ;;  %1175 = vadd.xlane.f32.xlu1 %v1174_v58 }
 0xa68   : > { %v1787_v59 = vpop.eup %1786 }
 0xa69   : > { %v1107_v60 = vsel %vm405_vm8, %v1787_v59, 0.0 }
 0xa6a   : > { %1108 = vadd.xlane.f32.xlu2 %v1107_v60 }
 0xa70   : > { %v979_v61 = vpop.permute.xlu0 %978 }
 0xa71   : > { %999 = vmatpush.msrb.mxu0 %v979_v61 }
 0xa78   : > { %v1180_v12 = vpop.permute.xlu0 %1179 }
 0xa7b   : > { %1112 = vrot.lane.b32.xlu1 %v2350_v20, %s2008_s14 }
 0xa80   : > { %v1721_v24 = vpop.permute.xlu0 %1720 }
 0xa81   : > { %v1723_v25 = vunpack.i.h.bf16 %v1721_v24  ;;  %v1722_v26 = vunpack.i.l.bf16 %v1721_v24 }
 0xa82   : > { %1045 = vrot.lane.b32.xlu2 %v2350_v20, %s2007_s12 }
 0xa83   : > { %1255 = vmatpush.msrb.mxu3 %v1722_v26 }
 0xa85   : > { %1256 = vmatpush.msrb.mxu3 %v1723_v25 }
 0xa88   : > { %v1726_v30 = vpop.permute.xlu0 %1725 }
 0xa89   : > { %v1728_v32 = vunpack.i.h.bf16 %v1726_v30  ;;  %v1727_v33 = vunpack.i.l.bf16 %v1726_v30 }
 0xa8b   : > { %1257 = vmatpush.msrb.mxu3 %v1727_v33 }
 0xa8d   : > { %1258 = vmatpush.msrb.mxu3 %v1728_v32 }
 0xa90   : > { %v1238_v39 = vpop.permute.xlu0 %1237 }
 0xac8   : > { %v975_v62 = vpop.xlane.xlu2 %974 }
 0xac9   : > { %1788 = vrcp.f32 %v975_v62  ;;  %v1293_v62 = vperm.slane %v2347_v17, 1 }
 0xacd   : > { %v1042_v7 = vpop.xlane.xlu1 %1041 }
 0xace   : > { %1790 = vrcp.f32 %v1042_v7 }
 0xacf   : > { %v1789_v0 = vpop.eup %1788 }
 0xad0   : > { %v977_v1 = vmul.f32 %v1789_v0, %v1781_v48 }
 0xad2   : > { %1577 = vmatmul.msk.f32.vlgmr.msrb.gmra.mxu0 %vm405_vm8, %v977_v1 }
 0xad4   : > { %v1791_v9 = vpop.eup %1790 }
 0xad5   : > { %v1176_v27 = vpop.xlane.xlu1 %1175  ;;  %v1044_v10 = vmul.f32 %v1791_v9, %v1783_v51 }
 0xad6   : > { %1792 = vrcp.f32 %v1176_v27 }
 0xadc   : > { %v1793_v13 = vpop.eup %1792 }
 0xadd   : > { %v1109_v8 = vpop.xlane.xlu2 %1108  ;;  %v1178_v15 = vmul.f32 %v1793_v13, %v1785_v56 }
 0xade   : > { %1794 = vrcp.f32 %v1109_v8 }
 0xae4   : > { %v1795_v14 = vpop.eup %1794 }
 0xae5   : > { %v1046_v11 = vpop.permute.xlu2 %1045  ;;  %v1111_v18 = vmul.f32 %v1795_v14, %v1787_v59  ;;  %v1290_v59 = vpop.permute.xlu0 %1289 }
 0xae6   : > { %1066 = vmatpush.msra.mxu1 %v1046_v11 }
 0xae7   : > { %1580 = vmatmul.msk.f32.vlgmr.msra.gmra.mxu1 %vm405_vm8, %v1044_v10 }
 0xae8   : > { %1200 = vmatpush.msrb.mxu1 %v1180_v12 }
 0xaed   : > { %v1113_v19 = vpop.permute.xlu1 %1112  ;;  %v1731_v0 = vpop.permute.xlu0 %1730 }
 0xaee   : > { %1133 = vmatpush.msra.mxu0 %v1113_v19  ;;  %v1733_v1 = vunpack.i.h.bf16 %v1731_v0  ;;  %v1732_v7 = vunpack.i.l.bf16 %v1731_v0 }
 0xaef   : > { %1583 = vmatmul.msk.f32.vlgmr.msra.gmra.mxu0 %vm405_vm8, %v1111_v18  ;;  %1586 = vmatmul.msk.f32.vlgmr.msrb.gmra.mxu1 %vm405_vm8, %v1178_v15 }
 0xaf0   : > { %1309 = vmatpush.msrb.mxu0 %v911_v45  ;;  %1351 = vmatpush.msra.mxu2 %v1732_v7 }
 0xaf2   : > { %1310 = vmatpush.msrb.mxu0 %v909_v44  ;;  %1352 = vmatpush.msra.mxu2 %v1733_v1 }
 0xaf4   : > { %1311 = vmatpush.msrb.mxu0 %v907_v47 }
 0xb4f   : > { %v1001_v20 = vpop.f32.mrf.mxu0 }
 0xb64   : > { %v1068_v21 = vpop.f32.mrf.mxu1 }
 0xb65   : > { %1206 = vrot.lane.b32.xlu2 %v1068_v21, %s2010_s23 }
 0xb6c   : > { %v1135_v22 = vpop.f32.mrf.mxu0  ;;  %v1202_v23 = vpop.f32.mrf.mxu1 }
 0xb6d   : > { %1214 = vrot.lane.b32.xlu2 %v1202_v23, %s2011_s29  ;;  %1210 = vrot.lane.b32.xlu1 %v1135_v22, %s2012_s15 }
 0xbbf   : > { %v1207_v34 = vpop.permute.xlu2 %1206 }
 0xbc0   : > { %v1217_v31 = vsel %vm405_vm8, %v1001_v20, %v1207_v34 }
 0xbc7   : > { %v1215_v36 = vpop.permute.xlu2 %1214 }
 0xbdf   : > { %v1211_v35 = vpop.permute.xlu1 %1210 }
 0xbe0   : > { %v1218_v37 = vsel %vm683_vm10, %v1217_v31, %v1211_v35 }
 0xbe1   : > { %v1219_v38 = vsel %vm685_vm11, %v1218_v37, %v1215_v36 }
 0xbe2   : > { %1587 = vmatmul.msk.f32.vlgmr.msrb.gmra.mxu3 %vm378_vm7, %v1219_v38 }
 0xc65   : > { %v1260_v3 = vpop.f32.mrf.mxu3 }
 0xc66   : > { %v1261_v4 = vadd.f32 %v1260_v3, %v1238_v39 }
 0xc68   : > { %v1263_v28 = vadd.f32 %v1261_v4, %v2343_v16  ;;  %v905_v16 = vld [vmem:[#allocation8 + $0x48] sm:$0xff] }
 0xc69   : > { %v1734_v48 = vpack.i.bf16 %v905_v16, %v907_v47  ;;  %1312 = vmatpush.msrb.mxu0 %v905_v16 }
 0xc6a   : > { %v1264_v5 = vsel %vm378_vm7, %v1263_v28, 0.0 }
 0xc6b   : > { %1265 = vadd.xlane.f32.xlu1 %v1264_v5  ;;  %1735 = vrot.lane.b32.xlu0 %v1734_v48, %s2009_s20 }
 0xc73   : > { %1740 = vrot.lane.b32.xlu0 %v1729_v46, %s2005_s28 }
 0xc84   : > { %1745 = vrot.lane.b32.xlu1 %v1734_v48, %s2005_s28 }
 0xcdd   : > { %v1736_v8 = vpop.permute.xlu0 %1735 }
 0xcde   : > { %v1266_v6 = vpop.xlane.xlu1 %1265  ;;  %v1738_v27 = vunpack.i.h.bf16 %v1736_v8  ;;  %v1737_v9 = vunpack.i.l.bf16 %v1736_v8 }
 0xcdf   : > { %v1267_v29 = vmul.f32 %v1266_v6, %v2303_v63 }
 0xce0   : > { %1353 = vmatpush.msra.mxu2 %v1737_v9 }
 0xce1   : > { %v1268_v40 = vsub.f32 %v1263_v28, %v1267_v29 }
 0xce2   : > { %1354 = vmatpush.msra.mxu2 %v1738_v27 }
 0xce3   : > { %v1269_v41 = vmul.f32 %v1268_v40, %v1268_v40 }
 0xce5   : > { %v1270_v42 = vsel %vm378_vm7, %v1269_v41, 0.0  ;;  %v1741_v10 = vpop.permute.xlu0 %1740 }
 0xce6   : > { %1271 = vadd.xlane.f32.xlu2 %v1270_v42  ;;  %v1743_v11 = vunpack.i.h.bf16 %v1741_v10  ;;  %v1742_v12 = vunpack.i.l.bf16 %v1741_v10 }
 0xce8   : > { %1385 = vmatpush.msra.mxu1 %v1742_v12 }
 0xcea   : > { %1386 = vmatpush.msra.mxu1 %v1743_v11 }
 0xcf6   : > { %v1746_v17 = vpop.permute.xlu1 %1745 }
 0xcf7   : > { %v1747_v13 = vunpack.i.l.bf16 %v1746_v17  ;;  %v1748_v14 = vunpack.i.h.bf16 %v1746_v17 }
 0xcf9   : > { %1387 = vmatpush.msra.mxu1 %v1747_v13 }
 0xcfb   : > { %1388 = vmatpush.msra.mxu1 %v1748_v14 }
 0xcfe   : > { %1394 = vrot.lane.b32.xlu2 %v1293_v62, %s2005_s28 }
 0xd06   : > { %1421 = vrot.lane.b32.xlu2 %v2401_v43, %s2005_s28 }
 0xd0e   : > { %1425 = vrot.lane.b32.xlu2 %v2401_v43, %s2009_s20 }
 0xd59   : > { %v1272_v49 = vpop.xlane.xlu2 %1271 }
 0xd5a   : > { %v1273_v2 = vmul.f32 %v1272_v49, %v2303_v63 }
 0xd5c   : > { %v1274_v50 = vadd.f32 1e-05, %v1273_v2 }
 0xd5e   : > { %1796 = vrsqrt.f32 %v1274_v50  ;;  %vm1281_vm4 = vweird.f32 %v1274_v50 }
 0xd61   : > { %v1395_v22 = vpop.permute.xlu2 %1394 }
 0xd64   : > { %v1797_v51 = vpop.eup %1796 }
 0xd65   : > { %v1276_v52 = vmul.f32 %v1797_v51, %v1274_v50  ;;  %vm1282_vm3 = vweird.f32 %v1797_v51 }
 0xd66   : > { %vm1283_vm5 = vmor %vm1281_vm4, %vm1282_vm3 }
 0xd67   : > { %v1277_v53 = vmul.f32 %v1797_v51, %v1276_v52 }
 0xd69   : > { %v1278_v54 = vmul.f32 0.5, %v1277_v53  ;;  %v1422_v4 = vpop.permute.xlu2 %1421 }
 0xd6b   : > { %v1279_v55 = vsub.f32 1.5, %v1278_v54 }
 0xd6d   : > { %v1280_v56 = vmul.f32 %v1797_v51, %v1279_v55 }
 0xd6f   : > { %v1284_v57 = vsel %vm1283_vm5, %v1797_v51, %v1280_v56 }
 0xd70   : > { %v1285_v58 = vmul.f32 %v1284_v57, %v1268_v40 }
 0xd71   : > { %v1426_v40 = vpop.permute.xlu2 %1425 }
 0xd72   : > { %v1287_v60 = vmul.f32 %v2401_v43, %v1285_v58 }
 0xd74   : > { %v1292_v61 = vadd.f32 %v1290_v59, %v1287_v60 }
 0xd76   : > { %1588 = vmatmul.msk.f32.vlgmr.msrb.gmra.mxu0 %vm378_vm7, %v1292_v61 }
 0xdf3   : > { %v1314_v15 = vpop.f32.mrf.mxu0 }
 0xdf4   : > { %v1315_v18 = vadd.f32 %v1314_v15, %v1293_v62 }
 0xdf6   : > { %v1317_v19 = vmax.f32 %v1315_v18, 0.0 }
 0xdf8   : > { %1319 = vrot.lane.b32.xlu0 %v1317_v19, %s2000_s16  ;;  %1590 = vmatmul.msk.f32.vlgmr.msra.gmra.mxu1 %vm378_vm7, %v1317_v19  ;;  %s1930_s16 = scalar_lea.hbm %s1929_s13, 8 }
 0xdf9   : > { %p1931_p0 = scmp.ne.s32.totalorder %s1929_s13, %s1930_s16  ;;  %p1936_p4 = scmp.lt.s32.totalorder %s1934_s26, %s1930_s16 }
 0xdfb   : > { %p1932_p1 = pnand %p1931_p0, %p2098_p5  ;;  %p1937_p7 = por %p1936_p4, %p1935_p3 }
 0xdfd   : > { %p1933_p2 = pneg %p1932_p1 }
 0xdff   : > { %p1938_p8 = pnand %p1937_p7, %p1933_p2 }
 0xe6a   : > { %v1320_v43 = vpop.permute.xlu0 %1319 }
 0xe6b   : > { %1589 = vmatmul.msk.f32.vlgmr.msra.gmra.mxu2 %vm378_vm7, %v1320_v43 }
 0xe75   : > { %v1390_v20 = vpop.f32.mrf.mxu1 }
 0xeee   : > { %v1356_v21 = vpop.f32.mrf.mxu2 }
 0xeef   : > { %v1391_v23 = vadd.f32 %v1390_v20, %v1356_v21 }
 0xef1   : > { %v1397_v24 = vadd.f32 %v1395_v22, %v1391_v23 }
 0xef3   : > { %v1398_v25 = vadd.f32 %v1397_v24, %v1292_v61 }
 0xef5   : > { %v1399_v26 = vsel %vm378_vm7, %v1398_v25, 0.0 }
 0xef6   : > { %1400 = vadd.xlane.f32.xlu0 %v1399_v26 }
 0xf69   : > { %v1401_v30 = vpop.xlane.xlu0 %1400 }
 0xf6a   : > { %v1402_v32 = vmul.f32 %v1401_v30, %v2303_v63 }
 0xf6c   : > { %v1403_v33 = vsub.f32 %v1398_v25, %v1402_v32 }
 0xf6e   : > { %v1404_v34 = vmul.f32 %v1403_v33, %v1403_v33 }
 0xf70   : > { %v1405_v31 = vsel %vm378_vm7, %v1404_v34, 0.0 }
 0xf71   : > { %1406 = vadd.xlane.f32.xlu1 %v1405_v31 }
 0xfe4   : > { %v1407_v35 = vpop.xlane.xlu1 %1406 }
 0xfe5   : > { %v1408_v36 = vmul.f32 %v1407_v35, %v2303_v63 }
 0xfe7   : > { %v1409_v37 = vadd.f32 1e-05, %v1408_v36 }
 0xfe9   : > { %1798 = vrsqrt.f32 %v1409_v37  ;;  %vm1416_vm8 = vweird.f32 %v1409_v37 }
 0xfef   : > { %v1799_v38 = vpop.eup %1798 }
 0xff0   : > { %v1411_v39 = vmul.f32 %v1799_v38, %v1409_v37  ;;  %vm1417_vm6 = vweird.f32 %v1799_v38 }
 0xff1   : > { %vm1418_vm9 = vmor %vm1416_vm8, %vm1417_vm6 }
 0xff2   : > { %v1412_v3 = vmul.f32 %v1799_v38, %v1411_v39 }
 0xff4   : > { %v1413_v28 = vmul.f32 0.5, %v1412_v3 }
 0xff6   : > { %v1414_v5 = vsub.f32 1.5, %v1413_v28 }
 0xff8   : > { %v1415_v6 = vmul.f32 %v1799_v38, %v1414_v5 }
 0xffa   : > { %v1419_v63 = vsel %vm1418_vm9, %v1799_v38, %v1415_v6 }
 0xffb   : > { %v1420_v29 = vmul.f32 %v1419_v63, %v1403_v33 }
 0xffd   : > { %v1424_v41 = vmul.f32 %v1422_v4, %v1420_v29 }
 0xfff   : > { %v1428_v42 = vadd.f32 %v1426_v40, %v1424_v41 }
0x1001   : > { %1429 = vst.msk [vmem:[%s278_s6] sm:$0xff] %vm378_vm7, %v1428_v42 }
0x1002   : > { %1941 = shalt.err (!%p1938_p8)
}
0x1003   : > { %1607 = dma.vmem_to_hbm [thread:$0]  (%p2098_p5), %s1444_s2, 128, %s1446_s10, %s1431_s11  }
0x1004 PF: > { %p1629_p9 = scmp.ge.s32.totalorder %s1986_s1, 2  ;;  %s1457_s25 = sand.u32 1, %s1974_s9  }
0x1005   : > { %s1458_s12 = scalar_lea.sflag [#allocation7], %s1457_s25 }
0x1006   : > { %p1620_p10 = pnand %p1629_p9, %p2102_p6 }
0x1008   : > { %p1621_p11 = pneg %p1620_p10 }
0x100a   : > { %1969 = dma.done.wait (%p1621_p11), %s1458_s12, 128  }
0x100b   : > { %1971 = vsyncadd (%p1621_p11), %s1458_s12, 4294967168  ;;  %s2512_s1 = sld [smem:[#allocation17_spill]]  ;;  %s2515_s9 = smov %s1978_s0 }
0x100c   : > { %s2513_s14 = sld [smem:[#allocation16_spill]] }
0x100d   : > { %s2514_s10 = sld [smem:[#allocation18_spill]] }
0x1011   : > { %p32_p12 = scmp.ge.s32.totalorder %s2512_s1, 4  }
0x1012   : > { %s2516_s0 = smov %s2513_s14 }
0x1013   :  { %34 = sbr.rel (!%p32_p12) target bundleno = 15 (0xf), region = 98 }
0x1018   :  { %1464 = vsyncpa [#allocation6], 1 }
0x1019   :  { %1466 = vsyncpa [#allocation6 + $0x1], 1 }
0x101a   :  { %1467 = vsyncpa [#allocation9], 1 }
0x101b   :  { %1468 = vsyncpa [#allocation7], 1 }
0x101c   :  { %1470 = vsyncpa [#allocation7 + $0x1], 1 }

</bundles_post_ra>
